<compile_context>
chip_gen: v5e
topology: v5e:2x2
jax: 0.10.0
libtpu: 0.0.40
codegen_flags: <defaults>
</compile_context>

<pallas_src>
import functools

import jax
import jax.numpy as jnp
from jax.experimental import pallas as pl
from jax.experimental.pallas import tpu as pltpu


def _cdiv(a, b):
    return -(-a // b)


def _round_up(a, b):
    return _cdiv(a, b) * b


def _vmem_capacity_bytes():
    """Best-effort per-core VMEM capacity; conservative (v7x-sized) fallback."""
    try:
        info = pltpu.get_tpu_info()
        for name in ("vmem_capacity_bytes", "vmem_size_bytes", "vmem_bytes"):
            v = getattr(info, name, None)
            if v:
                return int(v)
    except Exception:
        pass
    return 64 * 1024 * 1024


# ----------------------------------------------------------------------------
# Pallas kernel: tap-folded single MXU dot + folded-BN bias + ReLU epilogue.
# ----------------------------------------------------------------------------
def _conv_bn_relu_kernel(x_ref, w_ref, b_ref, o_ref, *, k, th, wo, apply_relu):
    # x_ref: (1, 1, th+k-1, Wp, C1p) bf16 -- row slab covering exactly this block's taps
    # w_ref: (k*k*C1p, C2p)          bf16 -- BN-scale-folded weight, (kh, kw, c)-major rows
    # b_ref: (1, C2p)                f32  -- folded BN bias
    # o_ref: (1, th, wo, C2p)        f32  -- output row-block (lane-dense C2p)
    c1p = x_ref.shape[-1]

    # Build the (th*wo, k*k*C1p) patch in VMEM (static slices, lane concat along channels).
    taps = []
    for kh in range(k):
        for kw in range(k):
            taps.append(x_ref[0, 0, pl.ds(kh, th), pl.ds(kw, wo), :])
    patch = taps[0] if len(taps) == 1 else jnp.concatenate(taps, axis=-1)
    a = patch.reshape(th * wo, k * k * c1p)

    # Single MXU contraction per block (K = k*k*C1p), f32 accumulation.
    y = jnp.dot(a, w_ref[...], preferred_element_type=jnp.float32)
    y = y + b_ref[...]                      # broadcast (1, C2p) folded-BN bias
    if apply_relu:
        y = jnp.maximum(y, 0.0)
    o_ref[...] = y.reshape(o_ref.shape).astype(o_ref.dtype)


# ----------------------------------------------------------------------------
# Wrapper: layout plumbing + parameter folding + pallas_call.
# ----------------------------------------------------------------------------
def conv_bn_act_nchw(x, weight, gamma, beta, mean, var, *, k, s, p, eps, apply_relu):
    """x: (N, C1, H, W) f32; weight: (C2, C1, k, k) f32 -> (N, C2, Ho, Wo) f32."""
    N, C1, H, W = x.shape
    C2 = weight.shape[0]
    if s != 1:
        raise NotImplementedError("TODO(synk): stride > 1 path not implemented")

    Ho = (H + 2 * p - k) // s + 1
    Wo = (W + 2 * p - k) // s + 1
    Wp = W + 2 * p

    C1p = _round_up(C1, 8)                  # contraction channel padding
    C2p = _round_up(C2, 128)                # lane-dense output channels
    KK = k * k * C1p                        # folded contraction depth

    # ---- generation-aware VMEM planning --------------------------------------------------
    cap = _vmem_capacity_bytes()            # 128 MiB on v5e/v6e, 64 MiB on v7x
    budget = int(cap * 0.70)                # headroom for compiler-internal scratch / sems

    def _est(th_):
        thi = th_ + k - 1
        return (2 * thi * Wp * C1p * 2      # x slab, double-buffered, bf16
                + 2 * KK * C2p * 2          # weight (2 pipeline buffers), bf16
                + 2 * C2p * 4               # bias (2 buffers), f32
                + 2 * th_ * Wo * C2p * 4    # output block, double-buffered, f32
                + th_ * Wo * KK * 2         # in-kernel patch value, bf16
                + th_ * Wo * C2p * 4)       # dot result, f32

    th = max(1, min(Ho, max(1, 2048 // max(Wo, 1))))
    while th < Ho and th * Wo < 8192 and _est(min(Ho, th * 2)) <= budget:
        th = min(Ho, th * 2)
    while th > 1 and _est(th) > budget:
        th = max(1, th // 2)
    HB = _cdiv(Ho, th)
    if N * HB < 2 and Ho >= 2:              # keep both v7x TensorCores busy
        th = _cdiv(Ho, 2)
        HB = _cdiv(Ho, th)
    Hop = HB * th                           # padded output rows
    THI = th + k - 1                        # input rows per slab (stride 1)
    Hin = Hop + k - 1                       # total padded-input rows required

    # ---- host-side layout plumbing (no HBM im2col: pad + overlapping row slabs) ----------
    xh = jnp.transpose(x, (0, 2, 3, 1))                                 # NCHW -> NHWC
    xh = jnp.pad(xh, ((0, 0), (p, Hin - H - p), (p, p), (0, C1p - C1)))
    xh = xh.astype(jnp.bfloat16)
    row_idx = jnp.arange(HB)[:, None] * th + jnp.arange(THI)[None, :]   # (HB, THI)
    x_slabs = xh[:, row_idx]                                            # (N, HB, THI, Wp, C1p)

    scale = gamma / jnp.sqrt(var + eps)
    wf = weight * scale[:, None, None, None]                            # fold BN scale
    wf = jnp.transpose(wf, (2, 3, 1, 0))                                # (k, k, C1, C2)
    wf = jnp.pad(wf, ((0, 0), (0, 0), (0, C1p - C1), (0, C2p - C2)))
    wf = wf.reshape(KK, C2p).astype(jnp.bfloat16)                       # (kh,kw,c)-major rows

    bias = beta - mean * scale
    bias = jnp.pad(bias, (0, C2p - C2)).reshape(1, C2p).astype(jnp.float32)

    kernel = functools.partial(_conv_bn_relu_kernel, k=k, th=th, wo=Wo,
                               apply_relu=apply_relu)

    cost = pl.CostEstimate(
        flops=2 * N * Ho * Wo * C2 * C1 * k * k,
        transcendentals=0,
        bytes_accessed=int(x_slabs.size * 2 + wf.size * 2 + bias.size * 4
                           + N * Hop * Wo * C2p * 4),
    )

    out = pl.pallas_call(
        kernel,
        out_shape=jax.ShapeDtypeStruct((N, Hop, Wo, C2p), jnp.float32),
        grid_spec=pltpu.PrefetchScalarGridSpec(
            num_scalar_prefetch=0,
            grid=(N, HB),
            in_specs=[
                pl.BlockSpec((1, 1, THI, Wp, C1p), lambda n, i: (n, i, 0, 0, 0)),  # row slab
                pl.BlockSpec((KK, C2p), lambda n, i: (0, 0)),                      # folded weight
                pl.BlockSpec((1, C2p), lambda n, i: (0, 0)),                       # folded bias
            ],
            out_specs=pl.BlockSpec((1, th, Wo, C2p), lambda n, i: (n, i, 0, 0)),
        ),
        compiler_params=pltpu.CompilerParams(
            dimension_semantics=("parallel", "parallel"),
            vmem_limit_bytes=min(int(cap * 0.85), 100 * 1024 * 1024),
        ),
        cost_estimate=cost,
    )(x_slabs, wf, bias)

    out = out[:, :Ho, :, :C2]                                           # drop row / lane padding
    return jnp.transpose(out, (0, 3, 1, 2))                             # NHWC -> NCHW


class ConvModulePallas:
    """JAX/Pallas port of PATHFinder ConvModule (Conv2d no-bias -> BN(eval) -> ReLU)."""

    def __init__(self, c1, c2, k=1, s=1, p=0, g=1, act=True, *, key=None):
        if g != 1:
            raise NotImplementedError("TODO(synk): grouped conv (g > 1) not supported")
        if act not in (True, False, None):
            raise NotImplementedError("TODO(synk): only ReLU / identity activations supported")
        self.c1, self.c2, self.k, self.s, self.p = c1, c2, k, s, p
        self.apply_relu = act is True
        key = jax.random.PRNGKey(0) if key is None else key
        kw, kg, kb, km, kv = jax.random.split(key, 5)
        # Deterministic synthetic parameters (stand-in for a checkpoint load).
        self.weight = 0.1 * jax.random.normal(kw, (c2, c1, k, k), jnp.float32)
        self.bn_gamma = 1.0 + 0.1 * jax.random.normal(kg, (c2,), jnp.float32)
        self.bn_beta = 0.1 * jax.random.normal(kb, (c2,), jnp.float32)
        self.bn_mean = 0.1 * jax.random.normal(km, (c2,), jnp.float32)
        self.bn_var = jnp.abs(1.0 + 0.1 * jax.random.normal(kv, (c2,), jnp.float32))
        self.eps = 1e-3     # matches nn.BatchNorm2d(c2, eps=0.001)

    def __call__(self, x):
        return conv_bn_act_nchw(
            x, self.weight, self.bn_gamma, self.bn_beta, self.bn_mean, self.bn_var,
            k=self.k, s=self.s, p=self.p, eps=self.eps, apply_relu=self.apply_relu)


# ----------------------------------------------------------------------------
# References for verification.
# ----------------------------------------------------------------------------
def _reference_matched(module, x):
    """lax.conv reference using the SAME bf16 operand rounding as the kernel (f32 accum)."""
    scale = module.bn_gamma / jnp.sqrt(module.bn_var + module.eps)
    w = (module.weight * scale[:, None, None, None]).astype(jnp.bfloat16)
    out = jax.lax.conv_general_dilated(
        x.astype(jnp.bfloat16), w,
        window_strides=(module.s, module.s),
        padding=[(module.p, module.p)] * 2,
        dimension_numbers=("NCHW", "OIHW", "NCHW"),
        preferred_element_type=jnp.float32)
    bias = (module.bn_beta - module.bn_mean * scale).reshape(1, -1, 1, 1)
    out = out + bias
    return jnp.maximum(out, 0.0) if module.apply_relu else out


def _reference_f32(module, x):
    """Pure-f32 reference with exact module semantics (conv -> BN(eval) -> ReLU)."""
    out = jax.lax.conv_general_dilated(
        x, module.weight,
        window_strides=(module.s, module.s),
        padding=[(module.p, module.p)] * 2,
        dimension_numbers=("NCHW", "OIHW", "NCHW"))
    scale = (module.bn_gamma / jnp.sqrt(module.bn_var + module.eps)).reshape(1, -1, 1, 1)
    bias = (module.bn_beta - module.bn_mean *
            (module.bn_gamma / jnp.sqrt(module.bn_var + module.eps))).reshape(1, -1, 1, 1)
    out = out * scale + bias
    return jnp.maximum(out, 0.0) if module.apply_relu else out


if __name__ == "__main__":
    key = jax.random.PRNGKey(0)
    kx, kp3, kp1 = jax.random.split(key, 3)

    N, C1, H, W = 2, 4, 16, 16
    C2 = 8
    x = jax.random.normal(kx, (N, C1, H, W), jnp.float32)

    # 3x3 / stride 1 / pad 1 ConvModule
    m3 = ConvModulePallas(C1, C2, k=3, s=1, p=1, g=1, act=True, key=kp3)
    out3 = jax.block_until_ready(m3(x))
    assert out3.shape == (N, C2, H, W), out3.shape
    ref3 = jax.block_until_ready(_reference_matched(m3, x))
    assert jnp.allclose(out3, ref3, atol=2e-3, rtol=2e-3), \
        float(jnp.max(jnp.abs(out3 - ref3)))
    ref3_f32 = jax.block_until_ready(_reference_f32(m3, x))
    assert jnp.allclose(out3, ref3_f32, atol=5e-2, rtol=5e-2), \
        float(jnp.max(jnp.abs(out3 - ref3_f32)))

    # 1x1 pointwise ConvModule (module defaults: k=1, s=1, p=0)
    m1 = ConvModulePallas(C1, C2, k=1, s=1, p=0, g=1, act=True, key=kp1)
    out1 = jax.block_until_ready(m1(x))
    assert out1.shape == (N, C2, H, W), out1.shape
    ref1 = jax.block_until_ready(_reference_matched(m1, x))
    assert jnp.allclose(out1, ref1, atol=2e-3, rtol=2e-3), \
        float(jnp.max(jnp.abs(out1 - ref1)))

    print("KERNEL_OK")
</pallas_src>

<mosaic_0001>
module attributes {stable_mosaic.version = 11 : i64} {
  func.func @_conv_bn_relu_kernel(%arg0: i32, %arg1: i32, %arg2: memref<1x1x18x18x8xbf16, #tpu.memory_space<vmem>>, %arg3: memref<72x128xbf16, #tpu.memory_space<vmem>>, %arg4: memref<1x128xf32, #tpu.memory_space<vmem>>, %arg5: memref<1x16x16x128xf32, #tpu.memory_space<vmem>>) attributes {dimension_semantics = [#tpu.dimension_semantics<parallel>, #tpu.dimension_semantics<parallel>], iteration_bounds = array<i64: 2, 1>, scalar_prefetch = 0 : i64, scratch_operands = 0 : i64, tpu.core_type = #tpu.core_type<tc>, window_params = [{transform_indices = @transform_0, window_bounds = array<i64: 1, 1, 18, 18, 8>}, {pipeline_mode = #tpu.pipeline_mode<synchronous>, transform_indices = @transform_1, window_bounds = array<i64: 72, 128>}, {pipeline_mode = #tpu.pipeline_mode<synchronous>, transform_indices = @transform_2, window_bounds = array<i64: 1, 128>}, {transform_indices = @transform_3, window_bounds = array<i64: 1, 16, 16, 128>}]} {
    %c0 = arith.constant 0 : index
    %c0_0 = arith.constant 0 : index
    %c0_1 = arith.constant 0 : index
    %c0_2 = arith.constant 0 : index
    %c0_3 = arith.constant 0 : index
    %0 = vector.load %arg2[%c0, %c0_0, %c0_1, %c0_2, %c0_3] : memref<1x1x18x18x8xbf16, #tpu.memory_space<vmem>>, vector<1x1x16x16x8xbf16>
    %1 = vector.shape_cast %0 : vector<1x1x16x16x8xbf16> to vector<16x16x8xbf16>
    %c0_4 = arith.constant 0 : index
    %c0_5 = arith.constant 0 : index
    %c0_6 = arith.constant 0 : index
    %c1 = arith.constant 1 : index
    %c0_7 = arith.constant 0 : index
    %2 = vector.load %arg2[%c0_4, %c0_5, %c0_6, %c1, %c0_7] : memref<1x1x18x18x8xbf16, #tpu.memory_space<vmem>>, vector<1x1x16x16x8xbf16>
    %3 = vector.shape_cast %2 : vector<1x1x16x16x8xbf16> to vector<16x16x8xbf16>
    %c0_8 = arith.constant 0 : index
    %c0_9 = arith.constant 0 : index
    %c0_10 = arith.constant 0 : index
    %c2 = arith.constant 2 : index
    %c0_11 = arith.constant 0 : index
    %4 = vector.load %arg2[%c0_8, %c0_9, %c0_10, %c2, %c0_11] : memref<1x1x18x18x8xbf16, #tpu.memory_space<vmem>>, vector<1x1x16x16x8xbf16>
    %5 = vector.shape_cast %4 : vector<1x1x16x16x8xbf16> to vector<16x16x8xbf16>
    %c0_12 = arith.constant 0 : index
    %c0_13 = arith.constant 0 : index
    %c1_14 = arith.constant 1 : index
    %c0_15 = arith.constant 0 : index
    %c0_16 = arith.constant 0 : index
    %6 = vector.load %arg2[%c0_12, %c0_13, %c1_14, %c0_15, %c0_16] : memref<1x1x18x18x8xbf16, #tpu.memory_space<vmem>>, vector<1x1x16x16x8xbf16>
    %7 = vector.shape_cast %6 : vector<1x1x16x16x8xbf16> to vector<16x16x8xbf16>
    %c0_17 = arith.constant 0 : index
    %c0_18 = arith.constant 0 : index
    %c1_19 = arith.constant 1 : index
    %c1_20 = arith.constant 1 : index
    %c0_21 = arith.constant 0 : index
    %8 = vector.load %arg2[%c0_17, %c0_18, %c1_19, %c1_20, %c0_21] : memref<1x1x18x18x8xbf16, #tpu.memory_space<vmem>>, vector<1x1x16x16x8xbf16>
    %9 = vector.shape_cast %8 : vector<1x1x16x16x8xbf16> to vector<16x16x8xbf16>
    %c0_22 = arith.constant 0 : index
    %c0_23 = arith.constant 0 : index
    %c1_24 = arith.constant 1 : index
    %c2_25 = arith.constant 2 : index
    %c0_26 = arith.constant 0 : index
    %10 = vector.load %arg2[%c0_22, %c0_23, %c1_24, %c2_25, %c0_26] : memref<1x1x18x18x8xbf16, #tpu.memory_space<vmem>>, vector<1x1x16x16x8xbf16>
    %11 = vector.shape_cast %10 : vector<1x1x16x16x8xbf16> to vector<16x16x8xbf16>
    %c0_27 = arith.constant 0 : index
    %c0_28 = arith.constant 0 : index
    %c2_29 = arith.constant 2 : index
    %c0_30 = arith.constant 0 : index
    %c0_31 = arith.constant 0 : index
    %12 = vector.load %arg2[%c0_27, %c0_28, %c2_29, %c0_30, %c0_31] : memref<1x1x18x18x8xbf16, #tpu.memory_space<vmem>>, vector<1x1x16x16x8xbf16>
    %13 = vector.shape_cast %12 : vector<1x1x16x16x8xbf16> to vector<16x16x8xbf16>
    %c0_32 = arith.constant 0 : index
    %c0_33 = arith.constant 0 : index
    %c2_34 = arith.constant 2 : index
    %c1_35 = arith.constant 1 : index
    %c0_36 = arith.constant 0 : index
    %14 = vector.load %arg2[%c0_32, %c0_33, %c2_34, %c1_35, %c0_36] : memref<1x1x18x18x8xbf16, #tpu.memory_space<vmem>>, vector<1x1x16x16x8xbf16>
    %15 = vector.shape_cast %14 : vector<1x1x16x16x8xbf16> to vector<16x16x8xbf16>
    %c0_37 = arith.constant 0 : index
    %c0_38 = arith.constant 0 : index
    %c2_39 = arith.constant 2 : index
    %c2_40 = arith.constant 2 : index
    %c0_41 = arith.constant 0 : index
    %16 = vector.load %arg2[%c0_37, %c0_38, %c2_39, %c2_40, %c0_41] : memref<1x1x18x18x8xbf16, #tpu.memory_space<vmem>>, vector<1x1x16x16x8xbf16>
    %17 = vector.shape_cast %16 : vector<1x1x16x16x8xbf16> to vector<16x16x8xbf16>
    %18 = tpu.concatenate %1, %3, %5, %7, %9, %11, %13, %15, %17 in 2 : vector<16x16x8xbf16>, vector<16x16x8xbf16>, vector<16x16x8xbf16>, vector<16x16x8xbf16>, vector<16x16x8xbf16>, vector<16x16x8xbf16>, vector<16x16x8xbf16>, vector<16x16x8xbf16>, vector<16x16x8xbf16> -> vector<16x16x72xbf16>
    %19 = vector.shape_cast %18 : vector<16x16x72xbf16> to vector<256x72xbf16>
    %c0_42 = arith.constant 0 : index
    %c0_43 = arith.constant 0 : index
    %20 = vector.load %arg3[%c0_42, %c0_43] : memref<72x128xbf16, #tpu.memory_space<vmem>>, vector<72x128xbf16>
    %cst = arith.constant dense<0.000000e+00> : vector<256x128xf32>
    %21 = tpu.matmul %19, %20, %cst {dimension_numbers = #tpu.dot_dimension_numbers<[1], [0], [0], [1], [0, 0, 1, 1], [], []>} : vector<256x72xbf16>, vector<72x128xbf16>, vector<256x128xf32> -> vector<256x128xf32>
    %c0_44 = arith.constant 0 : index
    %c0_45 = arith.constant 0 : index
    %22 = vector.load %arg4[%c0_44, %c0_45] : memref<1x128xf32, #tpu.memory_space<vmem>>, vector<1x128xf32>
    %23 = vector.broadcast %22 : vector<1x128xf32> to vector<256x128xf32>
    %24 = arith.addf %21, %23 : vector<256x128xf32>
    %cst_46 = arith.constant 0.000000e+00 : f32
    %25 = vector.broadcast %cst_46 : f32 to vector<256x128xf32>
    %26 = arith.maximumf %24, %25 : vector<256x128xf32>
    %27 = vector.shape_cast %26 : vector<256x128xf32> to vector<1x16x16x128xf32>
    %c0_47 = arith.constant 0 : index
    %c0_48 = arith.constant 0 : index
    %c0_49 = arith.constant 0 : index
    %c0_50 = arith.constant 0 : index
    %28 = vector.load %arg5[%c0_47, %c0_48, %c0_49, %c0_50] : memref<1x16x16x128xf32, #tpu.memory_space<vmem>>, vector<1x16x16x128xf32>
    tpu.vector_store %arg5[%c0_47, %c0_48, %c0_49, %c0_50], %27 {strides = array<i32>} : memref<1x16x16x128xf32, #tpu.memory_space<vmem>>, vector<1x16x16x128xf32>,
    return
  }
  func.func @transform_0(%arg0: i32, %arg1: i32) -> (i32, i32, i32, i32, i32) {
    %c0_i32 = arith.constant 0 : i32
    %c0_i32_0 = arith.constant 0 : i32
    %c0_i32_1 = arith.constant 0 : i32
    %c0_i32_2 = arith.constant 0 : i32
    return %arg0, %arg1, %c0_i32, %c0_i32_0, %c0_i32_1 : i32, i32, i32, i32, i32
  }
  func.func @transform_1(%arg0: i32, %arg1: i32) -> (i32, i32) {
    %c0_i32 = arith.constant 0 : i32
    %c0_i32_0 = arith.constant 0 : i32
    %c0_i32_1 = arith.constant 0 : i32
    return %c0_i32, %c0_i32_0 : i32, i32
  }
  func.func @transform_2(%arg0: i32, %arg1: i32) -> (i32, i32) {
    %c0_i32 = arith.constant 0 : i32
    %c0_i32_0 = arith.constant 0 : i32
    %c0_i32_1 = arith.constant 0 : i32
    return %c0_i32, %c0_i32_0 : i32, i32
  }
  func.func @transform_3(%arg0: i32, %arg1: i32) -> (i32, i32, i32, i32) {
    %c0_i32 = arith.constant 0 : i32
    %c0_i32_0 = arith.constant 0 : i32
    %c0_i32_1 = arith.constant 0 : i32
    return %arg0, %arg1, %c0_i32, %c0_i32_0 : i32, i32, i32, i32
  }
}

</mosaic_0001>

<bundles_post_ra>
// kernel: tpu_custom_call.1
= control target key start
LH: loop header
LB: loop body
LE: loop exit
PB: predicated region body
PF: predicated region fallthrough
CT: control target
= control target key end

     0   :  { %8 = vsyncpa [#allocation3], 0  ;;  %s4449_s0 = inlined_call_operand.vmem [shape: bf16[2,1,18,18,8], index: 0, kind: input, shape index: {}]   ;;  %s4450_s1 = inlined_call_operand.vmem [shape: bf16[72,128], index: 1, kind: input, shape index: {}]   ;;  %s4451_s2 = inlined_call_operand.vmem [shape: f32[1,128], index: 2, kind: input, shape index: {}]   ;;  %s4452_s3 = inlined_call_operand.hbm [shape: f32[2,16,16,128], index: 3, kind: output, shape index: {}]  }
   0x1   :  { %10 = vsyncpa [#allocation3 + $0x1], 0  ;;  %s3129_s12 = smov 0   ;;  %s3131_s13 = smov 0  }
   0x2   :  { %s3133_s14 = smov 0   ;;  %s3135_s15 = smov 0  }
   0x3   :  { %s3137_s16 = smov 0   ;;  %s3139_s17 = smov 0  }
   0x4 LB: > { %s2494_s18 = sadd.s32 4294967295, %s3098_s17   ;;  %s2495_s19 = sadd.s32 4294967294, %s3098_s17   ;;  %s3098_s17 = sphi %s3139_s17, %s16_s17   ;;  %s3094_s16 = sphi %s3137_s16, %s4465_s16   ;;  %s3090_s15 = sphi %s3135_s15, %s4464_s15   ;;  %s3086_s14 = sphi %s3133_s14, %s4463_s14   ;;  %s3082_s13 = sphi %s3131_s13, %s4462_s13   ;;  %s3078_s12 = sphi %s3129_s12, %s4461_s12  }
   0x5   : > { %s28_s20 = sadd.s32 1, %s3094_s16  ;;  %s107_s21 = sadd.s32 1, %s3086_s14 }
   0x6   : > { %p30_p0 = scmp.ge.s32.totalorder %s28_s20, 2  ;;  %p117_p1 = scmp.ne.s32.totalorder %s3086_s14, %s3082_s13 }
   0x7   : > { %p118_p2 = scmp.eq.s32.totalorder %s2494_s18, 1  ;;  %p123_p3 = scmp.ne.s32.totalorder %s3082_s13, %s3078_s12 }
   0x8   : > { %s4467_s20 = smov (%p30_p0, %s28_s20), 0  ;;  %p124_p5 = scmp.eq.s32.totalorder %s2495_s19, 1 }
   0x9   : > { %p3169_p4 = por %p118_p2, %p117_p1  ;;  %s102_s23 = ssub.s32 %s3094_s16, %s4467_s20 }
   0xa   : > { %p2498_p6 = scmp.ge.s32.totalorder %s3098_s17, 1  ;;  %p105_p7 = scmp.eq.s32.totalorder %s102_s23, 0 }
   0xb   : > { %p3176_p8 = por %p124_p5, %p123_p3  ;;  %p160_p9 = scmp.lt.s32.totalorder %s3098_s17, 3 }
   0xc   : > { %s3182_s25 = scalar_select %p105_p7, %s3086_s14, %s107_s21  }
   0xd   : > { %p161_p10 = pnand %p2498_p6, %p160_p9 }
   0xf   : > { %164 = sbr.rel (%p161_p10) target bundleno = 633 (0x279), region = 32 }
  0x14   : > { %p188_p11 = scmp.lt.s32.totalorder %s3090_s15, 1  ;;  %vm521_vm0 = vsmask.f32 7424  ;;  %s3100_s4 = smov 8   ;;  %vm794_vm1 = vcmask 1046528   ;;  %vm1899_vm2 = vcmask 64512  }
  0x15   : > { %s3101_s5 = smov 16   ;;  %s3102_s6 = smov 24   ;;  %vm1932_vm3 = vcmask 130048   ;;  %vm1965_vm4 = vcmask 195584   ;;  %vm2236_vm5 = vcmask 1043456   ;;  %vm1998_vm6 = vcmask 261120  }
  0x16   : > { %s189_s26 = scalar_select %p188_p11, %s3090_s15, 1  ;;  %vm2031_vm7 = vcmask 326656   ;;  %vm2064_vm8 = vcmask 392192   ;;  %vm2097_vm9 = vcmask 457728   ;;  %vm2130_vm10 = vcmask 523264  }
  0x17   : > { %s3103_s7 = smov 32   ;;  %s3104_s8 = smov 48   ;;  %vm2203_vm11 = vcmask 588800  }
  0x18   : > { %s2877_s27 = smul.u32 216, %s189_s26  ;;  %s3105_s9 = smov 40  }
  0x19   : > { %s3106_s10 = smov 56   ;;  %s3107_s11 = smov 64  }
  0x1a   : > { %s3189_s30 = scalar_lea.vmem %s4449_s0, %s2877_s27 }
  0x1b   : > { %v3192_v0 = vld [vmem:[%s3189_s30 + $0x30] sm:$0xff]   ;;  %v235_v1 = vld [vmem:[%s3189_s30 + $0x38] sm:$0x1]  ;;  %v233_v6 = vld [vmem:[%s3189_s30 + $0x20] sm:$0x1] }
  0x1c   : > { %v3196_v2 = vld [vmem:[%s3189_s30 + $0x18] sm:$0xff]   ;;  %v493_v3 = vunpack.c.l.b16 %v235_v1  ;;  %v571_v4 = vshrl.u32 %v3192_v0, 16  ;;  %v573_v5 = vshll.u32 %v3192_v0, 16  ;;  %v2672_v8 = vld [vmem:[%s3189_s30] sm:$0xff]   ;;  %v491_v9 = vunpack.c.l.b16 %v233_v6  ;;  %v231_v11 = vld [vmem:[%s3189_s30 + $0x8] sm:$0x1] }
  0x1d   : > { %v547_v7 = vshrl.u32 %v3196_v2, 16  ;;  %v549_v10 = vshll.u32 %v3196_v2, 16  ;;  %v523_v12 = vshrl.u32 %v2672_v8, 16  ;;  %v525_v13 = vshll.u32 %v2672_v8, 16  ;;  %v3206_v14 = vld [vmem:[%s3189_s30 + $0x60] sm:$0xff]   ;;  %v3236_v42 = vld [vmem:[%s3189_s30 + $0x48] sm:$0xff]  }
  0x1e   : > { %v3208_v15 = vpack.c.b16 %v493_v3, %v493_v3  ;;  %v575_v16 = vrot.slane %v573_v5, 1  ;;  %v489_v17 = vunpack.c.l.b16 %v231_v11  ;;  %v239_v18 = vld [vmem:[%s3189_s30 + $0x68] sm:$0x1]  ;;  %v619_v19 = vshrl.u32 %v3206_v14, 16  ;;  %v234_v30 = vld [vmem:[%s3189_s30 + $0x2c] sm:$0x1] }
  0x1f   : > { %v3212_v20 = vpack.c.b16 %v491_v9, %v491_v9  ;;  %v551_v21 = vrot.slane %v549_v10, 1  ;;  %v527_v22 = vrot.slane %v525_v13, 1  ;;  %v497_v23 = vunpack.c.l.b16 %v239_v18  ;;  %v3215_v24 = vld [vmem:[%s3189_s30 + $0x24] sm:$0xff]   ;;  %v237_v35 = vld [vmem:[%s3189_s30 + $0x50] sm:$0x1]  ;;  %v3248_v50 = vld [vmem:[%s3189_s30 + $0x3c] sm:$0xff]  }
  0x20   : > { %v3218_v25 = vld [vmem:[%s3189_s30 + $0x24] sm:$0xf0]  ;;  %v3220_v26 = vor.u32 %v575_v16, %v571_v4  ;;  %v578_v27 = vshll.u32 %v3208_v15, 16  ;;  %v3223_v28 = vpack.c.b16 %v489_v17, %v489_v17  ;;  %v621_v29 = vshll.u32 %v3206_v14, 16  ;;  %v3251_v51 = vld [vmem:[%s3189_s30 + $0x3c] sm:$0xf0] }
  0x21   : > { %v3227_v31 = vor.u32 %v551_v21, %v547_v7  ;;  %v554_v32 = vshll.u32 %v3212_v20, 16  ;;  %v528_v33 = vor.u32 %v527_v22, %v523_v12  ;;  %v3230_v34 = vpack.c.b16 %v497_v23, %v497_v23  ;;  %v236_v56 = vld [vmem:[%s3189_s30 + $0x44] sm:$0x1]  ;;  %v3261_v57 = vld [vmem:[%s3189_s30 + $0x54] sm:$0xff]   ;;  %v238_v3 = vld [vmem:[%s3189_s30 + $0x5c] sm:$0x1] }
  0x22   : > { %4457 = vst [vmem:[#allocation5_spill] sm:$0xff] %v3220_v26  ;;  %v580_v36 = vrot.slane %v578_v27, 1  ;;  %v530_v37 = vshll.u32 %v3223_v28, 16  ;;  %v623_v38 = vrot.slane %v621_v29, 1  ;;  %v492_v41 = vunpack.c.l.b16 %v234_v30  ;;  %v3264_v58 = vld [vmem:[%s3189_s30 + $0x54] sm:$0xf0] }
  0x23   : > { %v556_v39 = vrot.slane %v554_v32, 1  ;;  %v626_v40 = vshll.u32 %v3230_v34, 16  ;;  %v495_v46 = vunpack.c.l.b16 %v237_v35  ;;  %v595_v54 = vshrl.u32 %v3236_v42, 16  ;;  %v3275_v4 = vld [vmem:[%s3189_s30 + $0xc] sm:$0xff]   ;;  %v232_v16 = vld [vmem:[%s3189_s30 + $0x14] sm:$0x1] }
  0x24   : > { %v581_v43 = vsel %vm521_vm0, %v3220_v26, %v580_v36  ;;  %v532_v44 = vrot.slane %v530_v37, 1  ;;  %v3240_v45 = vor.u32 %v623_v38, %v619_v19  ;;  %v3245_v49 = vpack.c.b16 %v492_v41, %v492_v41  ;;  %v3278_v5 = vld [vmem:[%s3189_s30 + $0xc] sm:$0xf0]  ;;  %v3290_v21 = vld [vmem:[%s3189_s30 + $0x84] sm:$0xff]   ;;  %v242_v36 = vld [vmem:[%s3189_s30 + $0x8c] sm:$0x1] }
  0x25   : > { %722 = vrot.lane.b32.xlu2 %v581_v43, %s3100_s4  ;;  %v557_v47 = vsel %vm521_vm0, %v3227_v31, %v556_v39  ;;  %v628_v48 = vrot.slane %v626_v40, 1  ;;  %v3255_v53 = vpack.c.b16 %v495_v46, %v495_v46  ;;  %v597_v55 = vshll.u32 %v3236_v42, 16  ;;  %v3293_v22 = vld [vmem:[%s3189_s30 + $0x84] sm:$0xf0]  ;;  %v241_v43 = vld [vmem:[%s3189_s30 + $0x80] sm:$0x1] }
  0x26   : > { %4458 = vst [vmem:[#allocation6_spill] sm:$0xff] %v3240_v45  ;;  %718 = vrot.lane.b32.xlu1 %v557_v47, %s3100_s4  ;;  %v533_v52 = vsel %vm521_vm0, %v528_v33, %v532_v44  ;;  %v559_v60 = vshrl.u32 %v3215_v24, 16  ;;  %v561_v61 = vshll.u32 %v3215_v24, 16  ;;  %v566_v62 = vshll.u32 %v3245_v49, 16 }
  0x27   : > { %714 = vrot.lane.b32.xlu0 %v533_v52, %s3100_s4  ;;  %v629_v59 = vsel %vm521_vm0, %v3240_v45, %v628_v48  ;;  %v599_v63 = vrot.slane %v597_v55, 1  ;;  %v602_v1 = vshll.u32 %v3255_v53, 16  ;;  %v494_v8 = vunpack.c.l.b16 %v236_v56  ;;  %v3314_v56 = vld [vmem:[%s3189_s30 + $0x78] sm:$0xff]   ;;  %v2952_v45 = vld [vmem:[%s3189_s30 + $0x24] sm:$0xe] }
  0x28   : > { %v563_v6 = vrot.slane %v561_v61, 1  ;;  %v568_v7 = vrot.slane %v566_v62, 1  ;;  %v496_v13 = vunpack.c.l.b16 %v238_v3  ;;  %v583_v18 = vshrl.u32 %v3248_v50, 16  ;;  %v240_v3 = vld [vmem:[%s3189_s30 + $0x74] sm:$0x1] }
  0x29   : > { %v3280_v9 = vor.u32 %v599_v63, %v595_v54  ;;  %v604_v10 = vrot.slane %v602_v1, 1  ;;  %v3282_v12 = vpack.c.b16 %v494_v8, %v494_v8  ;;  %v585_v19 = vshll.u32 %v3248_v50, 16  ;;  %v3320_v63 = vld [vmem:[%s3189_s30 + $0x6c] sm:$0xff]  }
  0x2a   : > { %v564_v11 = vor.u32 %v563_v6, %v559_v60  ;;  %v3298_v29 = vpack.c.b16 %v496_v13, %v496_v13  ;;  %v607_v32 = vshrl.u32 %v3261_v57, 16  ;;  %v609_v33 = vshll.u32 %v3261_v57, 16  ;;  %v3323_v1 = vld [vmem:[%s3189_s30 + $0x6c] sm:$0xf0] }
  0x2b   : > { %v605_v17 = vsel %vm521_vm0, %v3280_v9, %v604_v10  ;;  %v590_v27 = vshll.u32 %v3282_v12, 16  ;;  %v587_v30 = vrot.slane %v585_v19, 1  ;;  %v490_v35 = vunpack.c.l.b16 %v232_v16 }
  0x2c   : > { %v569_v23 = vsel %vm521_vm0, %v564_v11, %v568_v7  ;;  %v614_v38 = vshll.u32 %v3298_v29, 16  ;;  %v611_v40 = vrot.slane %v609_v33, 1  ;;  %v535_v46 = vshrl.u32 %v3275_v4, 16 }
  0x2d   : > { %730 = vrot.lane.b32.xlu2 %v629_v59, %s3100_s4  ;;  %v592_v37 = vrot.slane %v590_v27, 1  ;;  %v588_v39 = vor.u32 %v587_v30, %v583_v18  ;;  %v3306_v41 = vpack.c.b16 %v490_v35, %v490_v35  ;;  %v537_v47 = vshll.u32 %v3275_v4, 16  ;;  %v245_v18 = vld [vmem:[%s3189_s30 + $0xb0] sm:$0x1]  ;;  %v3337_v27 = vld [vmem:[%s3189_s30 + $0xa8] sm:$0xff]  }
  0x2e   : > { %720 = vrot.lane.b32.xlu1 %v569_v23, %s3100_s4  ;;  %v616_v44 = vrot.slane %v614_v38, 1  ;;  %v500_v48 = vunpack.c.l.b16 %v242_v36  ;;  %v612_v54 = vor.u32 %v611_v40, %v607_v32  ;;  %v499_v61 = vunpack.c.l.b16 %v241_v43  ;;  %v3348_v40 = vld [vmem:[%s3189_s30 + $0x9c] sm:$0xf0] }
  0x2f   : > { %726 = vrot.lane.b32.xlu0 %v605_v17, %s3100_s4  ;;  %v593_v52 = vsel %vm521_vm0, %v588_v39, %v592_v37  ;;  %v542_v55 = vshll.u32 %v3306_v41, 16  ;;  %v539_v59 = vrot.slane %v537_v47, 1  ;;  %v643_v62 = vshrl.u32 %v3314_v56, 16  ;;  %v3345_v39 = vld [vmem:[%s3189_s30 + $0x9c] sm:$0xff]  }
  0x30   : > { %v3316_v60 = vpack.c.b16 %v500_v48, %v500_v48  ;;  %v617_v6 = vsel %vm521_vm0, %v612_v54, %v616_v44  ;;  %v655_v8 = vshrl.u32 %v3290_v21, 16  ;;  %v657_v10 = vshll.u32 %v3290_v21, 16  ;;  %v244_v48 = vld [vmem:[%s3189_s30 + $0xa4] sm:$0x1] }
  0x31   : > { %v544_v7 = vrot.slane %v542_v55, 1  ;;  %v540_v11 = vor.u32 %v539_v59, %v535_v46  ;;  %v3331_v16 = vpack.c.b16 %v499_v61, %v499_v61  ;;  %v645_v17 = vshll.u32 %v3314_v56, 16  ;;  %v243_v61 = vld [vmem:[%s3189_s30 + $0x98] sm:$0x1] }
  0x32   : > { %v662_v13 = vshll.u32 %v3316_v60, 16  ;;  %v659_v19 = vrot.slane %v657_v10, 1  ;;  %v498_v23 = vunpack.c.l.b16 %v240_v3  ;;  %v503_v38 = vunpack.c.l.b16 %v245_v18 }
  0x33   : > { %v545_v30 = vsel %vm521_vm0, %v540_v11, %v544_v7  ;;  %v647_v33 = vrot.slane %v645_v17, 1  ;;  %v650_v35 = vshll.u32 %v3331_v16, 16  ;;  %v691_v46 = vshrl.u32 %v3337_v27, 16  ;;  %v3365_v7 = vld [vmem:[%s3189_s30 + $0x90] sm:$0xff]  }
  0x34   : > { %v664_v32 = vrot.slane %v662_v13, 1  ;;  %v660_v36 = vor.u32 %v659_v19, %v655_v8  ;;  %v3342_v37 = vpack.c.b16 %v498_v23, %v498_v23  ;;  %v693_v47 = vshll.u32 %v3337_v27, 16  ;;  %v2949_v13 = vld [vmem:[%s3189_s30 + $0xc] sm:$0xe] }
  0x35   : > { %724 = vrot.lane.b32.xlu2 %v593_v52, %s3100_s4  ;;  %v3350_v43 = vor.u32 %v647_v33, %v643_v62  ;;  %v652_v44 = vrot.slane %v650_v35, 1  ;;  %v631_v54 = vshrl.u32 %v3320_v63, 16  ;;  %v633_v55 = vshll.u32 %v3320_v63, 16 }
  0x36   : > { %728 = vrot.lane.b32.xlu1 %v617_v6, %s3100_s4  ;;  %v665_v52 = vsel %vm521_vm0, %v660_v36, %v664_v32  ;;  %v638_v59 = vshll.u32 %v3342_v37, 16  ;;  %v3362_v3 = vpack.c.b16 %v503_v38, %v503_v38  ;;  %v695_v6 = vrot.slane %v693_v47, 1 }
  0x37   : > { %716 = vrot.lane.b32.xlu0 %v545_v30, %s3100_s4  ;;  %v653_v62 = vsel %vm521_vm0, %v3350_v43, %v652_v44  ;;  %v635_v8 = vrot.slane %v633_v55, 1  ;;  %v502_v11 = vunpack.c.l.b16 %v244_v48  ;;  %v501_v19 = vunpack.c.l.b16 %v243_v61  ;;  %v3384_v48 = vld [vmem:[%s3189_s30 + $0xb4] sm:$0xff]   ;;  %v2791_v61 = vld [vmem:[%s3189_s30] sm:$0xe] }
  0x38   : > { %v640_v10 = vrot.slane %v638_v59, 1  ;;  %v3369_v17 = vor.u32 %v695_v6, %v691_v46  ;;  %v698_v18 = vshll.u32 %v3362_v3, 16  ;;  %v669_v32 = vshll.u32 %v3365_v7, 16  ;;  %v2790_v59 = vld [vmem:[%s3189_s30] sm:$0xf0] }
  0x39   : > { %v636_v23 = vor.u32 %v635_v8, %v631_v54  ;;  %v3373_v30 = vpack.c.b16 %v502_v11, %v502_v11  ;;  %v3376_v35 = vpack.c.b16 %v501_v19, %v501_v19  ;;  %v667_v36 = vshrl.u32 %v3365_v7, 16  ;;  %v246_v11 = vld [vmem:[%s3189_s30 + $0xbc] sm:$0x1] }
  0x3a   : > { %v700_v33 = vrot.slane %v698_v18, 1  ;;  %v679_v44 = vshrl.u32 %v3345_v39, 16  ;;  %v681_v46 = vshll.u32 %v3345_v39, 16  ;;  %v671_v54 = vrot.slane %v669_v32, 1 }
  0x3b   : > { %v641_v38 = vsel %vm521_vm0, %v636_v23, %v640_v10  ;;  %v686_v47 = vshll.u32 %v3373_v30, 16  ;;  %v674_v55 = vshll.u32 %v3376_v35, 16  ;;  %v2950_v10 = vor.u32 %v2949_v13, %v3278_v5 }
  0x3c   : > { %v683_v6 = vrot.slane %v681_v46, 1  ;;  %v3397_v18 = vor.u32 %v671_v54, %v667_v36  ;;  %v2792_v32 = vor.u32 %v2791_v61, %v2790_v59  ;;  %v504_v26 = vunpack.c.l.b16 %v246_v11 }
  0x3d   : > { %736 = vrot.lane.b32.xlu2 %v665_v52, %s3100_s4  ;;  %v3387_v52 = vld [vmem:[%s3189_s30 + $0xb4] sm:$0xf0]  ;;  %v688_v8 = vrot.slane %v686_v47, 1  ;;  %v676_v19 = vrot.slane %v674_v55, 1  ;;  %v798_v5 = vrot.slane %v2950_v10, 1  ;;  %v796_v13 = vrot.slane %v3223_v28, 1 }
  0x3e   : > { %734 = vrot.lane.b32.xlu1 %v653_v62, %s3100_s4  ;;  %v701_v62 = vsel %vm521_vm0, %v3369_v17, %v700_v33  ;;  %v684_v23 = vor.u32 %v683_v6, %v679_v44  ;;  %v3407_v36 = vpack.c.b16 %v504_v26, %v504_v26  ;;  %v2796_v44 = vld [vmem:[%s3189_s30 + $0x30] sm:$0xf0]  ;;  %v795_v47 = vrot.slane %v2792_v32, 1  ;;  %v2794_v26 = vld [vmem:[%s3189_s30 + $0x18] sm:$0xe] }
  0x3f   : > { %732 = vrot.lane.b32.xlu0 %v641_v38, %s3100_s4  ;;  %v799_v38 = vrot.slane %v3306_v41, 1  ;;  %v677_v46 = vsel %vm521_vm0, %v3397_v18, %v676_v19  ;;  %v2797_v41 = vld [vmem:[%s3189_s30 + $0x30] sm:$0xe]  ;;  %v703_v54 = vshrl.u32 %v3384_v48, 16  ;;  %v705_v55 = vshll.u32 %v3384_v48, 16 }
  0x40   : > { %v689_v33 = vsel %vm521_vm0, %v684_v23, %v688_v8  ;;  %v710_v59 = vshll.u32 %v3407_v36, 16  ;;  %v2798_v6 = vor.u32 %v2797_v41, %v2796_v44  ;;  %v2793_v8 = vld [vmem:[%s3189_s30 + $0x18] sm:$0xf0]  ;;  %v2955_v10 = vld [vmem:[%s3189_s30 + $0x54] sm:$0xe]  ;;  %v797_v11 = vsel %vm794_vm1, %v795_v47, %v796_v13 }
  0x41   : > { %v800_v61 = vsel %vm794_vm1, %v798_v5, %v799_v38  ;;  %v2953_v23 = vor.u32 %v2952_v45, %v3218_v25  ;;  %v808_v32 = vrot.slane %v3208_v15, 1  ;;  %v2958_v5 = vld [vmem:[%s3189_s30 + $0x3c] sm:$0xe]  ;;  %v805_v13 = vrot.slane %v3245_v49, 1  ;;  %v2799_v45 = vld [vmem:[%s3189_s30 + $0x48] sm:$0xf0] }
  0x42   : > { %v712_v28 = vrot.slane %v710_v59, 1  ;;  %v802_v25 = vrot.slane %v3212_v20, 1  ;;  %v2800_v41 = vld [vmem:[%s3189_s30 + $0x48] sm:$0xe]  ;;  %v2961_v49 = vld [vmem:[%s3189_s30 + $0x6c] sm:$0xe] }
  0x43   : > { %v804_v44 = vrot.slane %v2953_v23, 1  ;;  %v2801_v59 = vor.u32 %v2800_v41, %v2799_v45  ;;  %v820_v45 = vrot.slane %v3230_v34, 1  ;;  %v2809_v41 = vld [vmem:[%s3189_s30 + $0x90] sm:$0xe] }
  0x45   : > { %742 = vrot.lane.b32.xlu2 %v701_v62, %s3100_s4  ;;  %v707_v62 = vrot.slane %v705_v55, 1  ;;  %v806_v55 = vsel %vm794_vm1, %v804_v44, %v805_v13 }
  0x46   : > { %740 = vrot.lane.b32.xlu1 %v689_v33, %s3100_s4  ;;  %v807_v33 = vrot.slane %v2798_v6, 1  ;;  %v2959_v6 = vor.u32 %v2958_v5, %v3251_v51  ;;  %v2964_v51 = vld [vmem:[%s3189_s30 + $0x9c] sm:$0xe] }
  0x47   : > { %738 = vrot.lane.b32.xlu0 %v677_v46, %s3100_s4  ;;  %v708_v19 = vor.u32 %v707_v62, %v703_v54  ;;  %v2795_v46 = vor.u32 %v2794_v26, %v2793_v8  ;;  %v2956_v54 = vor.u32 %v2955_v10, %v3264_v58  ;;  %v817_v62 = vrot.slane %v3298_v29, 1  ;;  %v2805_v8 = vld [vmem:[%s3189_s30 + $0x78] sm:$0xf0]  ;;  %v2806_v58 = vld [vmem:[%s3189_s30 + $0x78] sm:$0xe] }
  0x48   : > { %v809_v15 = vsel %vm794_vm1, %v807_v33, %v808_v32  ;;  %v814_v26 = vrot.slane %v3255_v53, 1  ;;  %v2807_v23 = vor.u32 %v2806_v58, %v2805_v8  ;;  %v2802_v32 = vld [vmem:[%s3189_s30 + $0x60] sm:$0xf0]  ;;  %v2803_v29 = vld [vmem:[%s3189_s30 + $0x60] sm:$0xe]  ;;  %v2962_v33 = vor.u32 %v2961_v49, %v3323_v1  ;;  %v3475_v58 = vld [vmem:[%s3189_s30 + $0xc] sm:$0xff]  }
  0x49   : > { %v713_v38 = vsel %vm521_vm0, %v708_v19, %v712_v28  ;;  %v801_v47 = vrot.slane %v2795_v46, 1  ;;  %v816_v20 = vrot.slane %v2956_v54, 1  ;;  %v813_v28 = vrot.slane %v2801_v59, 1  ;;  %v2808_v1 = vld [vmem:[%s3189_s30 + $0x90] sm:$0xf0] }
  0x4a   : > { %v811_v19 = vrot.slane %v3282_v12, 1  ;;  %v826_v53 = vrot.slane %v3331_v16, 1  ;;  %v825_v5 = vrot.slane %v2807_v23, 1  ;;  %v2804_v44 = vor.u32 %v2803_v29, %v2802_v32  ;;  %v2967_v12 = vld [vmem:[%s3189_s30 + $0x84] sm:$0xe] }
  0x4b   : > { %v818_v10 = vsel %vm794_vm1, %v816_v20, %v817_v62  ;;  %v822_v13 = vrot.slane %v2962_v33, 1  ;;  %v835_v49 = vrot.slane %v3373_v30, 1  ;;  %v832_v20 = vrot.slane %v3376_v35, 1  ;;  %v2811_v30 = vld [vmem:[%s3189_s30 + $0xa8] sm:$0xf0]  ;;  %v3492_v29 = vld [vmem:[%s3189_s30 + $0x24] sm:$0xff]  }
  0x4c   : > { %v819_v16 = vrot.slane %v2804_v44, 1  ;;  %v829_v8 = vrot.slane %v3316_v60, 1  ;;  %v838_v32 = vrot.slane %v3362_v3, 1  ;;  %v3503_v3 = vld [vmem:[%s3189_s30 + $0x54] sm:$0xff]   ;;  %v3511_v33 = vld [vmem:[%s3189_s30 + $0x3c] sm:$0xff]  }
  0x4d   : > { %845 = vrot.lane.b32.xlu2 %v800_v61, %s3101_s5  ;;  %v803_v61 = vsel %vm794_vm1, %v801_v47, %v802_v25  ;;  %v823_v25 = vrot.slane %v3342_v37, 1  ;;  %v2965_v47 = vor.u32 %v2964_v51, %v3348_v40  ;;  %v2970_v37 = vld [vmem:[%s3189_s30 + $0xb4] sm:$0xe]  ;;  %v3495_v51 = vld [vmem:[%s3189_s30 + $0x24] sm:$0xf0] }
  0x4e   : > { %843 = vrot.lane.b32.xlu1 %v797_v11, %s3101_s5  ;;  %v810_v11 = vrot.slane %v2959_v6, 1  ;;  %v821_v59 = vsel %vm794_vm1, %v819_v16, %v820_v45  ;;  %v3524_v44 = vld [vmem:[%s3189_s30 + $0x6c] sm:$0xf0]  ;;  %v3544_v45 = vld [vmem:[%s3189_s30 + $0x84] sm:$0xf0] }
  0x4f   : > { %744 = vrot.lane.b32.xlu0 %v713_v38, %s3100_s4  ;;  %v815_v38 = vsel %vm794_vm1, %v813_v28, %v814_v26  ;;  %v824_v54 = vsel %vm794_vm1, %v822_v13, %v823_v25  ;;  %v834_v34 = vrot.slane %v2965_v47, 1  ;;  %v3478_v28 = vld [vmem:[%s3189_s30 + $0xc] sm:$0xf0]  ;;  %v2525_v13 = vld [vmem:[%s3189_s30 + $0x9c] sm:$0xff]   ;;  %v3541_v25 = vld [vmem:[%s3189_s30 + $0x84] sm:$0xff]  }
  0x50   : > { %v812_v46 = vsel %vm794_vm1, %v810_v11, %v811_v19  ;;  %v841_v19 = vrot.slane %v3407_v36, 1  ;;  %v2533_v16 = vld [vmem:[%s3189_s30 + $0x14] sm:$0x1] }
  0x51   : > { %v836_v62 = vsel %vm794_vm1, %v834_v34, %v835_v49  ;;  %v3555_v47 = vld [vmem:[%s3189_s30 + $0xb4] sm:$0xff]   ;;  %v1003_v34 = vunpack.c.l.b16 %v2533_v16 }
  0x55   : > { %851 = vrot.lane.b32.xlu2 %v809_v15, %s3101_s5  ;;  %v827_v15 = vsel %vm794_vm1, %v825_v5, %v826_v53  ;;  %v3514_v53 = vld [vmem:[%s3189_s30 + $0x3c] sm:$0xf0]  ;;  %v2517_v5 = vld [vmem:[%s3189_s30 + $0x6c] sm:$0xff]  }
  0x56   : > { %849 = vrot.lane.b32.xlu1 %v806_v55, %s3101_s5  ;;  %v2810_v55 = vor.u32 %v2809_v41, %v2808_v1  ;;  %v2541_v41 = vld [vmem:[%s3189_s30 + $0x74] sm:$0x1] }
  0x57   : > { %847 = vrot.lane.b32.xlu0 %v803_v61, %s3101_s5  ;;  %v2968_v61 = vor.u32 %v2967_v12, %v3293_v22  ;;  %v2812_v22 = vld [vmem:[%s3189_s30 + $0xa8] sm:$0xe] }
  0x58   : > { %v831_v40 = vrot.slane %v2810_v55, 1  ;;  %v2813_v11 = vor.u32 %v2812_v22, %v2811_v30  ;;  %v1011_v55 = vunpack.c.l.b16 %v2541_v41 }
  0x59   : > { %v828_v6 = vrot.slane %v2968_v61, 1 }
  0x5a   : > { %v833_v26 = vsel %vm794_vm1, %v831_v40, %v832_v20  ;;  %v837_v23 = vrot.slane %v2813_v11, 1  ;;  %v3569_v40 = vpack.c.b16 %v1011_v55, %v1011_v55  ;;  %v1038_v20 = vshll.u32 %v3475_v58, 16 }
  0x5b   : > { %v830_v35 = vsel %vm794_vm1, %v828_v6, %v829_v8  ;;  %v3577_v6 = vld [vmem:[%s3189_s30 + $0xc0] sm:$0xff]   ;;  %v1180_v8 = vshrl.u32 %v2525_v13, 16 }
  0x5c   : > { %v839_v36 = vsel %vm794_vm1, %v837_v23, %v838_v32  ;;  %v1139_v11 = vshll.u32 %v3569_v40, 16  ;;  %v2973_v23 = vld [vmem:[%s3189_s30 + $0x9c] sm:$0xe] }
  0x5d   : > { %857 = vrot.lane.b32.xlu2 %v818_v10, %s3101_s5  ;;  %v2971_v10 = vor.u32 %v2970_v37, %v3387_v52  ;;  %v1182_v37 = vshll.u32 %v2525_v13, 16 }
  0x5e   : > { %855 = vrot.lane.b32.xlu1 %v815_v38, %s3101_s5  ;;  %v3506_v38 = vld [vmem:[%s3189_s30 + $0x54] sm:$0xf0]  ;;  %v1141_v16 = vrot.slane %v1139_v11, 1 }
  0x5f   : > { %853 = vrot.lane.b32.xlu0 %v812_v46, %s3101_s5  ;;  %v840_v60 = vrot.slane %v2971_v10, 1  ;;  %v1184_v30 = vrot.slane %v1182_v37, 1  ;;  %v1132_v10 = vshrl.u32 %v2517_v5, 16  ;;  %v2605_v37 = vld [vmem:[%s3189_s30 + $0x80] sm:$0x1] }
  0x61   : > { %v842_v52 = vsel %vm794_vm1, %v840_v60, %v841_v19  ;;  %v1036_v60 = vshrl.u32 %v3475_v58, 16  ;;  %v1040_v19 = vrot.slane %v1038_v20, 1  ;;  %v1185_v32 = vor.u32 %v1184_v30, %v1180_v8 }
  0x63   : > { %v1041_v55 = vor.u32 %v1040_v19, %v1036_v60  ;;  %v2537_v19 = vld [vmem:[%s3189_s30 + $0x44] sm:$0x1] }
  0x65   : > { %863 = vrot.lane.b32.xlu2 %v827_v15, %s3101_s5 }
  0x66   : > { %861 = vrot.lane.b32.xlu1 %v824_v54, %s3101_s5  ;;  %v3558_v54 = vld [vmem:[%s3189_s30 + $0xb4] sm:$0xf0] }
  0x67   : > { %859 = vrot.lane.b32.xlu0 %v821_v59, %s3101_s5 }
  0x6d   : > { %869 = vrot.lane.b32.xlu2 %v836_v62, %s3101_s5 }
  0x6e   : > { %867 = vrot.lane.b32.xlu1 %v833_v26, %s3101_s5  ;;  %v3580_v26 = vpack.c.b16 %v1003_v34, %v1003_v34 }
  0x6f   : > { %865 = vrot.lane.b32.xlu0 %v830_v35, %s3101_s5 }
  0x75   : > { %955 = vrot.lane.b32.xlu2 %v3475_v58, %s3102_s6 }
  0x76   : > { %873 = vrot.lane.b32.xlu1 %v842_v52, %s3101_s5 }
  0x77   : > { %871 = vrot.lane.b32.xlu0 %v839_v36, %s3101_s5  ;;  %v1043_v36 = vshll.u32 %v3580_v26, 16 }
  0x7d   : > { %961 = vrot.lane.b32.xlu2 %v3192_v0, %s3102_s6 }
  0x7e   : > { %959 = vrot.lane.b32.xlu1 %v3492_v29, %s3102_s6 }
  0x7f   : > { %v3518_v46 = vpop.permute.xlu2 %722  ;;  %957 = vrot.lane.b32.xlu0 %v3196_v2, %s3102_s6  ;;  %v3536_v2 = vld [vmem:[%s3189_s30 + $0x9c] sm:$0xf0] }
  0x80   : > { %v2974_v30 = vor.u32 %v2973_v23, %v3536_v2 }
  0x85   : > { %967 = vrot.lane.b32.xlu2 %v3503_v3, %s3102_s6 }
  0x86   : > { %965 = vrot.lane.b32.xlu1 %v3236_v42, %s3102_s6  ;;  %v2545_v42 = vld [vmem:[%s3189_s30 + $0xa4] sm:$0x1] }
  0x87   : > { %v3530_v12 = vpop.permute.xlu2 %730  ;;  %963 = vrot.lane.b32.xlu0 %v3511_v33, %s3102_s6  ;;  %v1015_v15 = vunpack.c.l.b16 %v2545_v42  ;;  %v2609_v42 = vld [vmem:[%s3189_s30 + $0xb0] sm:$0x1] }
  0x88   : > { %v1527_v20 = vunpack.c.l.b16 %v2609_v42 }
  0x89   : > { %v3561_v59 = vpack.c.b16 %v1015_v15, %v1015_v15 }
  0x8a   : > { %v3607_v11 = vpack.c.b16 %v1527_v20, %v1527_v20 }
  0x8b   : > { %v1187_v22 = vshll.u32 %v3561_v59, 16 }
  0x8d   : > { %973 = vrot.lane.b32.xlu2 %v3314_v56, %s3102_s6  ;;  %v1189_v52 = vrot.slane %v1187_v22, 1  ;;  %v1523_v22 = vunpack.c.l.b16 %v2605_v37 }
  0x8e   : > { %971 = vrot.lane.b32.xlu1 %v2517_v5, %s3102_s6 }
  0x8f   : > { %v3547_v1 = vpop.permute.xlu2 %724  ;;  %969 = vrot.lane.b32.xlu0 %v3206_v14, %s3102_s6  ;;  %v1134_v14 = vshll.u32 %v2517_v5, 16  ;;  %v2976_v5 = vld [vmem:[%s3189_s30 + $0x6c] sm:$0xe]  ;;  %v1190_v34 = vsel %vm521_vm0, %v1185_v32, %v1189_v52  ;;  %v1343_v52 = vrot.slane %v2974_v30, 1  ;;  %v3612_v42 = vpack.c.b16 %v1523_v22, %v1523_v22 }
  0x91   : > { %v1136_v35 = vrot.slane %v1134_v14, 1  ;;  %v1045_v14 = vrot.slane %v1043_v36, 1  ;;  %v1344_v36 = vrot.slane %v3561_v59, 1  ;;  %v1651_v59 = vshll.u32 %v3612_v42, 16 }
  0x93   : > { %v1137_v15 = vor.u32 %v1136_v35, %v1132_v10  ;;  %v1046_v10 = vsel %vm521_vm0, %v1041_v55, %v1045_v14  ;;  %v2977_v35 = vor.u32 %v2976_v5, %v3524_v44  ;;  %v1332_v44 = vrot.slane %v3569_v40, 1 }
  0x94   : > { %v1699_v5 = vshll.u32 %v3607_v11, 16  ;;  %v1345_v55 = vsel %vm794_vm1, %v1343_v52, %v1344_v36  ;;  %v1086_v40 = vshll.u32 %v3511_v33, 16 }
  0x95   : > { %979 = vrot.lane.b32.xlu2 %v2525_v13, %s3102_s6  ;;  %v1142_v8 = vsel %vm521_vm0, %v1137_v15, %v1141_v16  ;;  %v1331_v23 = vrot.slane %v2977_v35, 1  ;;  %v1007_v15 = vunpack.c.l.b16 %v2537_v19  ;;  %v2856_v35 = vld [vmem:[%s3189_s30 + $0xa8] sm:$0xf0] }
  0x96   : > { %977 = vrot.lane.b32.xlu1 %v3365_v7, %s3102_s6  ;;  %v1701_v14 = vrot.slane %v1699_v5, 1 }
  0x97   : > { %v3565_v49 = vpop.permute.xlu2 %736  ;;  %975 = vrot.lane.b32.xlu0 %v3541_v25, %s3102_s6  ;;  %v3628_v20 = vpack.c.b16 %v1007_v15, %v1007_v15  ;;  %v2979_v15 = vld [vmem:[%s3189_s30 + $0x3c] sm:$0xe] }
  0x98   : > { %v3567_v61 = vpop.permute.xlu1 %718  ;;  %v1702_v19 = vsel %vm521_vm0, %v3369_v17, %v1701_v14  ;;  %v2601_v14 = vld [vmem:[%s3189_s30 + $0x50] sm:$0x1] }
  0x99   : > { %v3574_v62 = vpop.permute.xlu0 %714  ;;  %v1091_v52 = vshll.u32 %v3628_v20, 16 }
  0x9d   : > { %985 = vrot.lane.b32.xlu2 %v3577_v6, %s3102_s6 }
  0x9e   : > { %983 = vrot.lane.b32.xlu1 %v3555_v47, %s3102_s6 }
  0x9f   : > { %v3590_v13 = vpop.permute.xlu2 %742  ;;  %981 = vrot.lane.b32.xlu0 %v3337_v27, %s3102_s6  ;;  %s3040_s6 = scalar_lea.hbm %s4452_s3, 512 }
  0xa0   : > { %v3594_v41 = vpop.permute.xlu1 %720 }
  0xa1   : > { %v3598_v58 = vpop.permute.xlu0 %726 }
  0xa5   : > { %1251 = vrot.lane.b32.xlu2 %v1190_v34, %s3103_s7  ;;  %v1333_v34 = vsel %vm794_vm1, %v1331_v23, %v1332_v44  ;;  %v2851_v23 = vld [vmem:[%s3189_s30 + $0x78] sm:$0xe] }
  0xa6   : > { %1243 = vrot.lane.b32.xlu1 %v1142_v8, %s3103_s7 }
  0xa7   : > { %v846_v60 = vpop.permute.xlu2 %845  ;;  %1227 = vrot.lane.b32.xlu0 %v1046_v10, %s3103_s7  ;;  %v1653_v10 = vrot.slane %v1651_v59, 1  ;;  %v2982_v59 = vld [vmem:[%s3189_s30 + $0xc] sm:$0xe] }
  0xa8   : > { %v729_v32 = vpop.permute.xlu1 %728 }
  0xa9   : > { %v717_v2 = vpop.permute.xlu0 %716  ;;  %v1654_v44 = vsel %vm521_vm0, %v3350_v43, %v1653_v10  ;;  %v1856_v10 = vrot.slane %v3607_v11, 1  ;;  %v2980_v11 = vor.u32 %v2979_v15, %v3514_v53  ;;  %v2542_v15 = vld [vmem:[%s3189_s30 + $0x80] sm:$0x1] }
  0xaa   : > { %v1903_v16 = vsel %vm1899_vm2, %v3275_v4, %v717_v2  ;;  %v1909_v4 = vsel %vm1899_vm2, %v3192_v0, %v3518_v46  ;;  %v1084_v0 = vshrl.u32 %v3511_v33, 16  ;;  %v1088_v46 = vrot.slane %v1086_v40, 1  ;;  %v2850_v2 = vld [vmem:[%s3189_s30 + $0x78] sm:$0xf0] }
  0xab   : > { %v3624_v37 = vsel %vm1932_vm3, %v1903_v16, %v846_v60  ;;  %v2857_v60 = vld [vmem:[%s3189_s30 + $0xa8] sm:$0xe]  ;;  %v2852_v33 = vor.u32 %v2851_v23, %v2850_v2  ;;  %v1915_v40 = vsel %vm1899_vm2, %v3261_v57, %v729_v32  ;;  %v1844_v57 = vrot.slane %v3612_v42, 1  ;;  %v2782_v23 = vld [vmem:[%s3189_s30 + $0x18] sm:$0xff]  }
  0xac   : > { %v2858_v5 = vor.u32 %v2857_v60, %v2856_v35  ;;  %v1089_v16 = vor.u32 %v1088_v46, %v1084_v0  ;;  %v2597_v60 = vld [vmem:[%s3189_s30 + $0x20] sm:$0x1]  ;;  %v1519_v32 = vunpack.c.l.b16 %v2601_v14  ;;  %v1550_v53 = vshll.u32 %v2782_v23, 16 }
  0xad   : > { %1483 = vrot.lane.b32.xlu2 %v3314_v56, %s3104_s8  ;;  %v1843_v0 = vrot.slane %v2852_v33, 1  ;;  %v2943_v14 = vld [vmem:[%s3189_s30] sm:$0xff]  }
  0xae   : > { %1379 = vrot.lane.b32.xlu1 %v1345_v55, %s3105_s9  ;;  %v1093_v55 = vrot.slane %v1091_v52, 1  ;;  %v3669_v52 = vld [vmem:[%s3189_s30 + $0x48] sm:$0xff]   ;;  %v3677_v42 = vpack.c.b16 %v1519_v32, %v1519_v32 }
  0xaf   : > { %v852_v8 = vpop.permute.xlu2 %851  ;;  %1371 = vrot.lane.b32.xlu0 %v1333_v34, %s3105_s9 }
  0xb0   : > { %v735_v30 = vpop.permute.xlu1 %734  ;;  %v3635_v22 = vsel %vm1932_vm3, %v1909_v4, %v852_v8  ;;  %v1855_v8 = vrot.slane %v2858_v5, 1  ;;  %v1845_v5 = vsel %vm794_vm1, %v1843_v0, %v1844_v57  ;;  %v1603_v57 = vshll.u32 %v3677_v42, 16 }
  0xb1   : > { %v3644_v36 = vpop.permute.xlu0 %732 }
  0xb2   : > { %v1857_v2 = vsel %vm794_vm1, %v1855_v8, %v1856_v10  ;;  %v1901_v8 = vsel %vm1899_vm2, %v2943_v14, %v3574_v62  ;;  %v1308_v10 = vrot.slane %v3580_v26, 1  ;;  %v2838_v14 = vld [vmem:[%s3189_s30 + $0x18] sm:$0xf0] }
  0xb5   : > { %1763 = vrot.lane.b32.xlu2 %v1702_v19, %s3106_s10  ;;  %v1094_v19 = vsel %vm521_vm0, %v1089_v16, %v1093_v55  ;;  %v1598_v16 = vshll.u32 %v3669_v52, 16  ;;  %v1921_v55 = vsel %vm1899_vm2, %v3314_v56, %v735_v30 }
  0xb6   : > { %1755 = vrot.lane.b32.xlu1 %v1654_v44, %s3106_s10  ;;  %v1515_v44 = vunpack.c.l.b16 %v2597_v60  ;;  %v1596_v60 = vshrl.u32 %v3669_v52, 16 }
  0xb7   : > { %v858_v34 = vpop.permute.xlu2 %857  ;;  %1491 = vrot.lane.b32.xlu0 %v3337_v27, %s3104_s8  ;;  %v2983_v27 = vor.u32 %v2982_v59, %v3478_v28  ;;  %v1320_v28 = vrot.slane %v3628_v20, 1  ;;  %v1600_v0 = vrot.slane %v1598_v16, 1  ;;  %v1012_v20 = vunpack.c.l.b16 %v2542_v15 }
  0xb8   : > { %v3658_v4 = vsel %vm1932_vm3, %v1915_v40, %v858_v34  ;;  %v741_v35 = vpop.permute.xlu1 %740  ;;  %v1319_v34 = vrot.slane %v2980_v11, 1  ;;  %v3688_v59 = vpack.c.b16 %v1515_v44, %v1515_v44  ;;  %v1552_v11 = vrot.slane %v1550_v53, 1 }
  0xb9   : > { %v3666_v46 = vpop.permute.xlu0 %738  ;;  %v1307_v30 = vrot.slane %v2983_v27, 1  ;;  %v1601_v27 = vor.u32 %v1600_v0, %v1596_v60  ;;  %v3704_v16 = vpack.c.b16 %v1012_v20, %v1012_v20  ;;  %v2546_v60 = vld [vmem:[%s3189_s30 + $0xb0] sm:$0x1]  ;;  %v2944_v0 = vld [vmem:[%s3189_s30 + $0x18] sm:$0xff]   ;;  %v3731_v20 = vld [vmem:[%s3189_s30 + $0x84] sm:$0xf0] }
  0xba   : > { %v1321_v62 = vsel %vm794_vm1, %v1319_v34, %v1320_v28  ;;  %v1555_v44 = vshll.u32 %v3688_v59, 16  ;;  %v1907_v34 = vsel %vm1899_vm2, %v3215_v24, %v3594_v41  ;;  %v1905_v24 = vsel %vm1899_vm2, %v2944_v0, %v3567_v61  ;;  %v2832_v61 = vld [vmem:[%s3189_s30 + $0xa8] sm:$0xf0]  ;;  %v2827_v0 = vld [vmem:[%s3189_s30 + $0x78] sm:$0xe] }
  0xbb   : > { %v1309_v26 = vsel %vm794_vm1, %v1307_v30, %v1308_v10  ;;  %v1151_v30 = vshll.u32 %v3704_v16, 16  ;;  %v2839_v10 = vld [vmem:[%s3189_s30 + $0x18] sm:$0xe] }
  0xbd   : > { %1235 = vrot.lane.b32.xlu2 %v1094_v19, %s3103_s7 }
  0xbe   : > { %1891 = vrot.lane.b32.xlu1 %v1857_v2, %s3107_s11  ;;  %v1548_v2 = vshrl.u32 %v2782_v23, 16 }
  0xbf   : > { %v864_v33 = vpop.permute.xlu2 %863  ;;  %1883 = vrot.lane.b32.xlu0 %v1845_v5, %s3107_s11  ;;  %v1605_v5 = vrot.slane %v1603_v57, 1  ;;  %v3728_v57 = vld [vmem:[%s3189_s30 + $0x84] sm:$0xff]  }
  0xc0   : > { %v3685_v40 = vsel %vm1932_vm3, %v1921_v55, %v864_v33  ;;  %v844_v56 = vpop.permute.xlu1 %843  ;;  %v1927_v55 = vsel %vm1899_vm2, %v3345_v39, %v741_v35  ;;  %v1553_v53 = vor.u32 %v1552_v11, %v1548_v2  ;;  %v2844_v39 = vld [vmem:[%s3189_s30 + $0x48] sm:$0xf0]  ;;  %v2845_v35 = vld [vmem:[%s3189_s30 + $0x48] sm:$0xe] }
  0xc1   : > { %v1934_v19 = vsel %vm1932_vm3, %v1901_v8, %v844_v56  ;;  %v3698_v32 = vpop.permute.xlu0 %744  ;;  %v1606_v56 = vsel %vm521_vm0, %v1601_v27, %v1605_v5  ;;  %v1153_v27 = vrot.slane %v1151_v30, 1  ;;  %v2833_v5 = vld [vmem:[%s3189_s30 + $0xa8] sm:$0xe] }
  0xc5   : > { %1467 = vrot.lane.b32.xlu2 %v2782_v23, %s3104_s8  ;;  %v1557_v23 = vrot.slane %v1555_v44, 1  ;;  %v2840_v44 = vor.u32 %v2839_v10, %v2838_v14  ;;  %v2834_v10 = vor.u32 %v2833_v5, %v2832_v61  ;;  %v3770_v5 = vld [vmem:[%s3189_s30 + $0xb4] sm:$0xff]  }
  0xc6   : > { %1363 = vrot.lane.b32.xlu1 %v1321_v62, %s3105_s9  ;;  %v2846_v62 = vor.u32 %v2845_v35, %v2844_v39  ;;  %v1832_v39 = vrot.slane %v3677_v42, 1 }
  0xc7   : > { %v870_v33 = vpop.permute.xlu2 %869  ;;  %1355 = vrot.lane.b32.xlu0 %v1309_v26, %s3105_s9  ;;  %v1558_v11 = vsel %vm521_vm0, %v1553_v53, %v1557_v23  ;;  %v1016_v26 = vunpack.c.l.b16 %v2546_v60  ;;  %v1819_v14 = vrot.slane %v2840_v44, 1  ;;  %v2826_v60 = vld [vmem:[%s3189_s30 + $0x78] sm:$0xf0] }
  0xc8   : > { %v3710_v15 = vsel %vm1932_vm3, %v1927_v55, %v870_v33  ;;  %v850_v28 = vpop.permute.xlu1 %849  ;;  %v2606_v33 = vld [vmem:[%s3189_s30 + $0x8c] sm:$0x1]  ;;  %v1831_v23 = vrot.slane %v2846_v62, 1  ;;  %v1346_v62 = vrot.slane %v2834_v10, 1 }
  0xc9   : > { %v1940_v8 = vsel %vm1932_vm3, %v1907_v34, %v850_v28  ;;  %v848_v41 = vpop.permute.xlu0 %847  ;;  %v2945_v34 = vld [vmem:[%s3189_s30 + $0x48] sm:$0xff]   ;;  %v1032_v30 = vpack.c.b16 %v1016_v26, %v1016_v26 }
  0xca   : > { %v3734_v2 = vsel %vm1932_vm3, %v1905_v24, %v848_v41  ;;  %v1913_v28 = vsel %vm1899_vm2, %v2945_v34, %v3598_v58  ;;  %v1524_v24 = vunpack.c.l.b16 %v2606_v33 }
  0xcb   : > { %v1347_v44 = vrot.slane %v1032_v30, 1  ;;  %v1199_v26 = vshll.u32 %v1032_v30, 16 }
  0xcd   : > { %1747 = vrot.lane.b32.xlu2 %v1606_v56, %s3106_s10  ;;  %v1820_v56 = vrot.slane %v3688_v59, 1  ;;  %v1833_v59 = vsel %vm794_vm1, %v1831_v23, %v1832_v39  ;;  %v1348_v39 = vsel %vm794_vm1, %v1346_v62, %v1347_v44  ;;  %v1925_v44 = vsel %vm1899_vm2, %v3365_v7, %v3666_v46  ;;  %v2534_v46 = vld [vmem:[%s3189_s30 + $0x20] sm:$0x1] }
  0xce   : > { %1739 = vrot.lane.b32.xlu1 %v1558_v11, %s3106_s10  ;;  %v2828_v11 = vor.u32 %v2827_v0, %v2826_v60  ;;  %v2985_v60 = vld [vmem:[%s3189_s30 + $0xb4] sm:$0xe] }
  0xcf   : > { %v956_v55 = vpop.permute.xlu2 %955  ;;  %1475 = vrot.lane.b32.xlu0 %v3669_v52, %s3104_s8  ;;  %v1911_v52 = vsel %vm1899_vm2, %v3248_v50, %v3547_v1  ;;  %v1821_v61 = vsel %vm794_vm1, %v1819_v14, %v1820_v56  ;;  %v2984_v50 = vld [vmem:[%s3189_s30 + $0xb4] sm:$0xf0]  ;;  %v1656_v56 = vshrl.u32 %v3728_v57, 16 }
  0xd0   : > { %v3746_v53 = vsel %vm1965_vm4, %v1934_v19, %v956_v55  ;;  %v856_v35 = vpop.permute.xlu1 %855  ;;  %v1154_v19 = vsel %vm521_vm0, %v3350_v43, %v1153_v27  ;;  %v3766_v43 = vpack.c.b16 %v1524_v24, %v1524_v24  ;;  %v1658_v27 = vshll.u32 %v3728_v57, 16 }
  0xd1   : > { %v1946_v58 = vsel %vm1932_vm3, %v1913_v28, %v856_v35  ;;  %v854_v42 = vpop.permute.xlu0 %853  ;;  %v1919_v55 = vsel %vm1899_vm2, %v3320_v63, %v3644_v36  ;;  %v1334_v34 = vrot.slane %v2828_v11, 1  ;;  %v1335_v28 = vrot.slane %v3704_v16, 1  ;;  %v2610_v36 = vld [vmem:[%s3189_s30 + $0xbc] sm:$0x1] }
  0xd2   : > { %v3761_v41 = vsel %vm1932_vm3, %v1911_v52, %v854_v42  ;;  %v1201_v35 = vrot.slane %v1199_v26, 1  ;;  %v1660_v30 = vrot.slane %v1658_v27, 1  ;;  %v1663_v63 = vshll.u32 %v3766_v43, 16  ;;  %v2988_v52 = vld [vmem:[%s3189_s30 + $0x84] sm:$0xe] }
  0xd3   : > { %v1528_v24 = vunpack.c.l.b16 %v2610_v36  ;;  %v1004_v36 = vunpack.c.l.b16 %v2534_v46 }
  0xd4   : > { %v1202_v42 = vsel %vm521_vm0, %v3369_v17, %v1201_v35  ;;  %v1665_v11 = vrot.slane %v1663_v63, 1  ;;  %v2538_v17 = vld [vmem:[%s3189_s30 + $0x50] sm:$0x1]  ;;  %v1704_v35 = vshrl.u32 %v3770_v5, 16 }
  0xd5   : > { %1245 = vrot.lane.b32.xlu2 %v1154_v19, %s3103_s7  ;;  %v1336_v19 = vsel %vm794_vm1, %v1334_v34, %v1335_v28  ;;  %v1544_v27 = vpack.c.b16 %v1528_v24, %v1528_v24  ;;  %v2986_v34 = vor.u32 %v2985_v60, %v2984_v50 }
  0xd6   : > { %1875 = vrot.lane.b32.xlu1 %v1833_v59, %s3107_s11  ;;  %v1661_v59 = vor.u32 %v1660_v30, %v1656_v56 }
  0xd7   : > { %v962_v1 = vpop.permute.xlu2 %961  ;;  %1867 = vrot.lane.b32.xlu0 %v1821_v61, %s3107_s11  ;;  %v1706_v61 = vshll.u32 %v3770_v5, 16  ;;  %v1711_v50 = vshll.u32 %v1544_v27, 16  ;;  %v1858_v30 = vrot.slane %v2986_v34, 1  ;;  %v1859_v63 = vrot.slane %v1544_v27, 1  ;;  %v3857_v34 = vld [vmem:[%s3189_s30 + $0x24] sm:$0xff]  }
  0xd8   : > { %v3778_v33 = vsel %vm1965_vm4, %v1940_v8, %v962_v1  ;;  %v862_v23 = vpop.permute.xlu1 %861  ;;  %v2946_v8 = vld [vmem:[%s3189_s30 + $0x60] sm:$0xff]  }
  0xd9   : > { %v1952_v14 = vsel %vm1932_vm3, %v1919_v55, %v862_v23  ;;  %v1917_v10 = vsel %vm1899_vm2, %v2946_v8, %v3530_v12  ;;  %v860_v16 = vpop.permute.xlu0 %859  ;;  %v1666_v55 = vsel %vm521_vm0, %v1661_v59, %v1665_v11  ;;  %v2989_v23 = vor.u32 %v2988_v52, %v3731_v20  ;;  %v2815_v8 = vld [vmem:[%s3189_s30 + $0x18] sm:$0xe]  ;;  %v2947_v11 = vld [vmem:[%s3189_s30 + $0xa8] sm:$0xff]  }
  0xda   : > { %v3792_v0 = vsel %vm1932_vm3, %v1917_v10, %v860_v16  ;;  %v1708_v56 = vrot.slane %v1706_v61, 1  ;;  %v1847_v16 = vrot.slane %v3766_v43, 1  ;;  %v1713_v52 = vrot.slane %v1711_v50, 1  ;;  %v3852_v61 = vld [vmem:[%s3189_s30 + $0x54] sm:$0xf0] }
  0xdb   : > { %v1846_v20 = vrot.slane %v2989_v23, 1  ;;  %v1020_v43 = vpack.c.b16 %v1004_v36, %v1004_v36  ;;  %v2602_v23 = vld [vmem:[%s3189_s30 + $0x5c] sm:$0x1] }
  0xdc   : > { %v1709_v24 = vor.u32 %v1708_v56, %v1704_v35 }
  0xdd   : > { %1381 = vrot.lane.b32.xlu2 %v1348_v39, %s3105_s9  ;;  %v1008_v39 = vunpack.c.l.b16 %v2538_v17  ;;  %v1311_v17 = vrot.slane %v1020_v43, 1 }
  0xde   : > { %1373 = vrot.lane.b32.xlu1 %v1336_v19, %s3105_s9  ;;  %v1931_v19 = vsel %vm1899_vm2, %v3384_v48, %v3698_v32  ;;  %v1714_v27 = vsel %vm521_vm0, %v1709_v24, %v1713_v52 }
  0xdf   : > { %v968_v12 = vpop.permute.xlu2 %967  ;;  %1253 = vrot.lane.b32.xlu0 %v1202_v42, %s3103_s7  ;;  %v3831_v60 = vpack.c.b16 %v1008_v39, %v1008_v39  ;;  %v1860_v42 = vsel %vm794_vm1, %v1858_v30, %v1859_v63  ;;  %v2598_v30 = vld [vmem:[%s3189_s30 + $0x2c] sm:$0x1]  ;;  %v2991_v63 = vld [vmem:[%s3189_s30 + $0x24] sm:$0xe] }
  0xe0   : > { %v3801_v62 = vsel %vm1965_vm4, %v1946_v58, %v968_v12  ;;  %v868_v26 = vpop.permute.xlu1 %867  ;;  %v1923_v58 = vsel %vm1899_vm2, %v3290_v21, %v3565_v49  ;;  %v2814_v49 = vld [vmem:[%s3189_s30 + $0x18] sm:$0xf0]  ;;  %v1929_v12 = vsel %vm1899_vm2, %v2947_v11, %v3590_v13 }
  0xe1   : > { %v3810_v1 = vsel %vm1932_vm3, %v1925_v44, %v868_v26  ;;  %v866_v7 = vpop.permute.xlu0 %865  ;;  %v2816_v59 = vor.u32 %v2815_v8, %v2814_v49  ;;  %v1103_v44 = vshll.u32 %v3831_v60, 16  ;;  %v3849_v26 = vld [vmem:[%s3189_s30 + $0x54] sm:$0xff]   ;;  %v2821_v49 = vld [vmem:[%s3189_s30 + $0x48] sm:$0xe]  ;;  %v1520_v8 = vunpack.c.l.b16 %v2602_v23 }
  0xe2   : > { %v3818_v28 = vsel %vm1932_vm3, %v1923_v58, %v866_v7  ;;  %v2990_v58 = vld [vmem:[%s3189_s30 + $0x24] sm:$0xf0]  ;;  %v1610_v52 = vshll.u32 %v3849_v26, 16  ;;  %v1560_v23 = vshrl.u32 %v3857_v34, 16 }
  0xe3   : > { %v1310_v13 = vrot.slane %v2816_v59, 1  ;;  %v1105_v46 = vrot.slane %v1103_v44, 1  ;;  %v1562_v59 = vshll.u32 %v3857_v34, 16  ;;  %v1323_v44 = vrot.slane %v3831_v60, 1  ;;  %v2171_v60 = vld [vmem:[%s4450_s1 + $0x20] sm:$0xf] }
  0xe5   : > { %1757 = vrot.lane.b32.xlu2 %v1666_v55, %s3106_s10  ;;  %v1055_v55 = vshll.u32 %v1020_v43, 16  ;;  %v1312_v56 = vsel %vm794_vm1, %v1310_v13, %v1311_v17  ;;  %v1612_v17 = vrot.slane %v1610_v52, 1 }
  0xe6   : > { %1493 = vrot.lane.b32.xlu1 %v3770_v5, %s3104_s8 }
  0xe7   : > { %v974_v21 = vpop.permute.xlu2 %973  ;;  %1485 = vrot.lane.b32.xlu0 %v3728_v57, %s3104_s8  ;;  %v1848_v57 = vsel %vm794_vm1, %v1846_v20, %v1847_v16  ;;  %v1057_v50 = vrot.slane %v1055_v55, 1  ;;  %v1106_v16 = vsel %vm521_vm0, %v3280_v9, %v1105_v46 }
  0xe8   : > { %v3828_v10 = vsel %vm1965_vm4, %v1952_v14, %v974_v21  ;;  %v874_v5 = vpop.permute.xlu1 %873  ;;  %v2820_v21 = vld [vmem:[%s3189_s30 + $0x48] sm:$0xf0] }
  0xe9   : > { %v1964_v14 = vsel %vm1932_vm3, %v1931_v19, %v874_v5  ;;  %v872_v48 = vpop.permute.xlu0 %871  ;;  %v1058_v19 = vsel %vm521_vm0, %v3227_v31, %v1057_v50  ;;  %v2822_v5 = vor.u32 %v2821_v49, %v2820_v21  ;;  %v2543_v31 = vld [vmem:[%s3189_s30 + $0x8c] sm:$0x1] }
  0xea   : > { %v3844_v32 = vsel %vm1932_vm3, %v1929_v12, %v872_v48  ;;  %v2992_v12 = vor.u32 %v2991_v63, %v2990_v58  ;;  %v1206_v63 = vshll.u32 %v3555_v47, 16 }
  0xed   : > { %1893 = vrot.lane.b32.xlu2 %v1860_v42, %s3107_s11  ;;  %v3885_v42 = vpack.c.b16 %v1520_v8, %v1520_v8 }
  0xee   : > { %1885 = vrot.lane.b32.xlu1 %v1848_v57, %s3107_s11  ;;  %v1322_v57 = vrot.slane %v2822_v5, 1 }
  0xef   : > { %v3861_v7 = vpop.permute.xlu2 %979  ;;  %1765 = vrot.lane.b32.xlu0 %v1714_v27, %s3106_s10  ;;  %v1615_v55 = vshll.u32 %v3885_v42, 16 }
  0xf0   : > { %v960_v39 = vpop.permute.xlu1 %959 }
  0xf1   : > { %v3867_v35 = vsel %vm1965_vm4, %v3734_v2, %v960_v39  ;;  %v958_v36 = vpop.permute.xlu0 %957  ;;  %v1516_v2 = vunpack.c.l.b16 %v2598_v30  ;;  %v1822_v39 = vrot.slane %v2992_v12, 1  ;;  %v2193_v30 = vunpack.c.l.b16 %v2171_v60 }
  0xf2   : > { %v3876_v20 = vsel %vm1965_vm4, %v3624_v37, %v958_v36  ;;  %v2547_v37 = vld [vmem:[%s3189_s30 + $0xbc] sm:$0x1]  ;;  %v1617_v8 = vrot.slane %v1615_v55, 1 }
  0xf3   : > { %v1532_v11 = vpack.c.b16 %v1516_v2, %v1516_v2  ;;  %v1017_v27 = vunpack.c.l.b16 %v2547_v37  ;;  %v2198_v2 = vpack.c.b16 %v2193_v30, %v2193_v30  ;;  %v2607_v30 = vld [vmem:[%s3189_s30 + $0x98] sm:$0x1] }
  0xf5   : > { %1357 = vrot.lane.b32.xlu2 %v1312_v56, %s3105_s9  ;;  %v1823_v58 = vrot.slane %v1532_v11, 1  ;;  %v1564_v56 = vrot.slane %v1562_v59, 1  ;;  %v1567_v50 = vshll.u32 %v1532_v11, 16  ;;  %v3913_v36 = vpack.c.b16 %v1017_v27, %v1017_v27 }
  0xf6   : > { %1237 = vrot.lane.b32.xlu1 %v1106_v16, %s3103_s7  ;;  %v2994_v16 = vld [vmem:[%s3189_s30 + $0x54] sm:$0xe]  ;;  %v1208_v59 = vrot.slane %v1206_v63, 1 }
  0xf7   : > { %v986_v24 = vpop.permute.xlu2 %985  ;;  %1229 = vrot.lane.b32.xlu0 %v1058_v19, %s3103_s7  ;;  %v1565_v52 = vor.u32 %v1564_v56, %v1560_v23  ;;  %v1569_v37 = vrot.slane %v1567_v50, 1  ;;  %v1211_v11 = vshll.u32 %v3913_v36, 16  ;;  %v3000_v23 = vld [vmem:[%s3189_s30 + $0x84] sm:$0xe]  ;;  %v2668_v56 = vld [vmem:[%s4450_s1 + $0x10] sm:$0xff] }
  0xf8   : > { %v3889_v43 = vsel %vm1965_vm4, %v1964_v14, %v986_v24  ;;  %v966_v9 = vpop.permute.xlu1 %965  ;;  %v1608_v14 = vshrl.u32 %v3849_v26, 16  ;;  %v1824_v24 = vsel %vm794_vm1, %v1822_v39, %v1823_v58 }
  0xf9   : > { %v3896_v48 = vsel %vm1965_vm4, %v3761_v41, %v966_v9  ;;  %v964_v13 = vpop.permute.xlu0 %963  ;;  %v1013_v41 = vunpack.c.l.b16 %v2543_v31  ;;  %v1204_v9 = vshrl.u32 %v3555_v47, 16  ;;  %v1213_v58 = vrot.slane %v1211_v11, 1 }
  0xfa   : > { %v3903_v46 = vsel %vm1965_vm4, %v3635_v22, %v964_v13  ;;  %v1324_v22 = vsel %vm794_vm1, %v1322_v57, %v1323_v44  ;;  %v1613_v49 = vor.u32 %v1612_v17, %v1608_v14  ;;  %v1156_v44 = vshrl.u32 %v3541_v25, 16  ;;  %v2669_v13 = vld [vmem:[%s4450_s1 + $0x18] sm:$0xff]  ;;  %v2997_v14 = vld [vmem:[%s3189_s30 + $0xb4] sm:$0xe] }
  0xfb   : > { %v3921_v19 = vpack.c.b16 %v1013_v41, %v1013_v41  ;;  %v1570_v17 = vsel %vm521_vm0, %v1565_v52, %v1569_v37  ;;  %v1209_v55 = vor.u32 %v1208_v59, %v1204_v9  ;;  %v2611_v41 = vld [vmem:[%s3189_s30 + $0xc8] sm:$0x1]  ;;  %v1218_v52 = vshll.u32 %v3577_v6, 16  ;;  %v2787_v37 = vld [vmem:[%s3189_s30 + $0x90] sm:$0xff]   ;;  %v2535_v59 = vld [vmem:[%s3189_s30 + $0x2c] sm:$0x1] }
  0xfc   : > { %v1618_v31 = vsel %vm521_vm0, %v1613_v49, %v1617_v8  ;;  %v1529_v8 = vunpack.c.l.b16 %v2611_v41  ;;  %v1670_v11 = vshll.u32 %v2787_v37, 16 }
  0xfd   : > { %1477 = vrot.lane.b32.xlu2 %v3849_v26, %s3104_s8  ;;  %v1158_v26 = vshll.u32 %v3541_v25, 16  ;;  %v1163_v47 = vshll.u32 %v3921_v19, 16 }
  0xfe   : > { %1469 = vrot.lane.b32.xlu1 %v3857_v34, %s3104_s8  ;;  %v2238_v34 = vsel %vm2236_vm5, %v2198_v2, 0  ;;  %v3973_v9 = vpack.c.b16 %v1529_v8, %v1529_v8 }
  0xff   : > { %v3917_v21 = vpop.permute.xlu2 %1251  ;;  %1365 = vrot.lane.b32.xlu0 %v1324_v22, %s3105_s9  ;;  %2863 = vmatpush.bf16.msra.mxu2 %v2238_v34  ;;  %v1160_v27 = vrot.slane %v1158_v26, 1  ;;  %v1165_v39 = vrot.slane %v1163_v47, 1  ;;  %v1214_v22 = vsel %vm521_vm0, %v1209_v55, %v1213_v58  ;;  %v2998_v26 = vor.u32 %v2997_v14, %v3558_v54 }
 0x100   : > { %v3924_v5 = vpop.permute.xlu1 %971  ;;  %2864 = vmatpush.bf16.msra.mxu3 %v2238_v34  ;;  %2243 = vmatpush.bf16.msra.mxu0 %v2238_v34  ;;  %v1220_v47 = vrot.slane %v1218_v52, 1  ;;  %v1723_v55 = vshll.u32 %v3973_v9, 16  ;;  %v1005_v58 = vunpack.c.l.b16 %v2535_v59  ;;  %v2539_v59 = vld [vmem:[%s3189_s30 + $0x5c] sm:$0x1] }
 0x101   : > { %v970_v12 = vpop.permute.xlu0 %969  ;;  %2862 = vmatpush.bf16.msra.mxu1 %v2238_v34  ;;  %v1161_v60 = vor.u32 %v1160_v27, %v1156_v44  ;;  %v3001_v34 = vor.u32 %v3000_v23, %v3544_v45  ;;  %v2666_v45 = vld [vmem:[%s4450_s1] sm:$0xff]  ;;  %v1216_v27 = vshrl.u32 %v3577_v6, 16  ;;  %v1668_v23 = vshrl.u32 %v2787_v37, 16 }
 0x102   : > { %v3932_v57 = vsel %vm1965_vm4, %v3658_v4, %v970_v12  ;;  %v2995_v4 = vor.u32 %v2994_v16, %v3852_v61  ;;  %v1835_v61 = vrot.slane %v3885_v42, 1  ;;  %v1349_v12 = vrot.slane %v2998_v26, 1  ;;  %v2853_v26 = vld [vmem:[%s3189_s30 + $0x90] sm:$0xf0] }
 0x103   : > { %2866 = vmatpush.bf16.msra.mxu2 %v2669_v13  ;;  %v1166_v42 = vsel %vm521_vm0, %v1161_v60, %v1165_v39  ;;  %v1337_v14 = vrot.slane %v3001_v34, 1  ;;  %v1672_v60 = vrot.slane %v1670_v11, 1  ;;  %v2854_v34 = vld [vmem:[%s3189_s30 + $0x90] sm:$0xe]  ;;  %v3003_v11 = vld [vmem:[%s3189_s30 + $0x54] sm:$0xe] }
 0x104   : > { %2867 = vmatpush.bf16.msra.mxu3 %v2669_v13  ;;  %2244 = vmatpush.bf16.msra.mxu0 %v2669_v13  ;;  %v1834_v49 = vrot.slane %v2995_v4, 1 }
 0x105   : > { %1869 = vrot.lane.b32.xlu2 %v1824_v24, %s3107_s11  ;;  %2865 = vmatpush.bf16.msra.mxu1 %v2669_v13  ;;  %v2667_v24 = vld [vmem:[%s4450_s1 + $0x8] sm:$0xff] }
 0x106   : > { %1749 = vrot.lane.b32.xlu1 %v1618_v31, %s3106_s10  ;;  %v1350_v31 = vrot.slane %v3913_v36, 1  ;;  %v1338_v36 = vrot.slane %v3921_v19, 1  ;;  %v1062_v19 = vshll.u32 %v3492_v29, 16 }
 0x107   : > { %v3945_v25 = vpop.permute.xlu2 %1483  ;;  %1741 = vrot.lane.b32.xlu0 %v1570_v17, %s3106_s10  ;;  %2869 = vmatpush.bf16.msra.mxu2 %v2668_v56 }
 0x108   : > { %v978_v50 = vpop.permute.xlu1 %977  ;;  %2870 = vmatpush.bf16.msra.mxu3 %v2668_v56  ;;  %2245 = vmatpush.bf16.msra.mxu0 %v2668_v56  ;;  %v1351_v39 = vsel %vm794_vm1, %v1349_v12, %v1350_v31  ;;  %v1064_v52 = vrot.slane %v1062_v19, 1 }
 0x109   : > { %v3956_v63 = vsel %vm1965_vm4, %v3818_v28, %v978_v50  ;;  %v976_v16 = vpop.permute.xlu0 %975  ;;  %v1525_v28 = vunpack.c.l.b16 %v2607_v30  ;;  %2868 = vmatpush.bf16.msra.mxu1 %v2668_v56  ;;  %v4001_v56 = vor.u32 %v1220_v47, %v1216_v27  ;;  %v1339_v50 = vsel %vm794_vm1, %v1337_v14, %v1338_v36  ;;  %v3006_v27 = vld [vmem:[%s3189_s30 + $0x24] sm:$0xe] }
 0x10a   : > { %v3961_v2 = vsel %vm1965_vm4, %v3685_v40, %v976_v16  ;;  %v1836_v40 = vsel %vm794_vm1, %v1834_v49, %v1835_v61  ;;  %v4004_v61 = vpack.c.b16 %v1005_v58, %v1005_v58  ;;  %v2859_v16 = vld [vmem:[%s3189_s30 + $0xc0] sm:$0xf0]  ;;  %v1009_v14 = vunpack.c.l.b16 %v2539_v59 }
 0x10b   : > { %2872 = vmatpush.bf16.msra.mxu2 %v2667_v24  ;;  %v3980_v44 = vpack.c.b16 %v1525_v28, %v1525_v28  ;;  %v1862_v58 = vrot.slane %v3973_v9, 1 }
 0x10c   : > { %2873 = vmatpush.bf16.msra.mxu3 %v2667_v24  ;;  %2246 = vmatpush.bf16.msra.mxu0 %v2667_v24 }
 0x10d   : > { %1255 = vrot.lane.b32.xlu2 %v1214_v22, %s3103_s7  ;;  %2871 = vmatpush.bf16.msra.mxu1 %v2667_v24  ;;  %v1673_v22 = vor.u32 %v1672_v60, %v1668_v23  ;;  %v1060_v24 = vshrl.u32 %v3492_v29, 16  ;;  %v2599_v29 = vld [vmem:[%s3189_s30 + $0x38] sm:$0x1]  ;;  %v1850_v60 = vrot.slane %v3980_v44, 1 }
 0x10e   : > { %1247 = vrot.lane.b32.xlu1 %v1166_v42, %s3103_s7  ;;  %v2860_v42 = vld [vmem:[%s3189_s30 + $0xc0] sm:$0xe] }
 0x10f   : > { %v3976_v54 = vpop.permute.xlu2 %1763  ;;  %1877 = vrot.lane.b32.xlu0 %v1836_v40, %s3107_s11  ;;  %2875 = vmatpush.bf16.msra.mxu2 %v2666_v45  ;;  %v2861_v31 = vor.u32 %v2860_v42, %v2859_v16  ;;  %v1065_v47 = vor.u32 %v1064_v52, %v1060_v24  ;;  %v3007_v16 = vor.u32 %v3006_v27, %v3495_v51  ;;  %v1108_v24 = vshrl.u32 %v3503_v3, 16 }
 0x110   : > { %v984_v13 = vpop.permute.xlu1 %983  ;;  %2876 = vmatpush.bf16.msra.mxu3 %v2666_v45  ;;  %2247 = vmatpush.bf16.msra.mxu0 %v2666_v45 }
 0x111   : > { %v3989_v17 = vsel %vm1965_vm4, %v3844_v32, %v984_v13  ;;  %v982_v4 = vpop.permute.xlu0 %981  ;;  %v1675_v32 = vshll.u32 %v3980_v44, 16  ;;  %2874 = vmatpush.bf16.msra.mxu1 %v2666_v45  ;;  %v2855_v45 = vor.u32 %v2854_v34, %v2853_v26  ;;  %v1313_v51 = vrot.slane %v3007_v16, 1  ;;  %v2841_v16 = vld [vmem:[%s3189_s30 + $0x30] sm:$0xf0] }
 0x112   : > { %v3995_v41 = vsel %vm1965_vm4, %v3710_v15, %v982_v4  ;;  %v1725_v15 = vrot.slane %v1723_v55, 1  ;;  %v1861_v55 = vrot.slane %v2861_v31, 1  ;;  %v1314_v34 = vrot.slane %v4004_v61, 1 }
 0x113   : > { %v1677_v49 = vrot.slane %v1675_v32, 1  ;;  %v1849_v23 = vrot.slane %v2855_v45, 1  ;;  %v1110_v32 = vshll.u32 %v3503_v3, 16 }
 0x114   : > { %v1726_v28 = vsel %vm521_vm0, %v4001_v56, %v1725_v15  ;;  %v3004_v15 = vor.u32 %v3003_v11, %v3506_v38  ;;  %v1863_v9 = vsel %vm794_vm1, %v1861_v55, %v1862_v58  ;;  %v1315_v55 = vsel %vm794_vm1, %v1313_v51, %v1314_v34 }
 0x115   : > { %1487 = vrot.lane.b32.xlu2 %v2787_v37, %s3104_s8  ;;  %v1067_v37 = vshll.u32 %v4004_v61, 16  ;;  %v1678_v12 = vsel %vm521_vm0, %v1673_v22, %v1677_v49  ;;  %v4039_v22 = vld [vmem:[%s3189_s30 + $0x30] sm:$0xff]   ;;  %v1112_v38 = vrot.slane %v1110_v32, 1  ;;  %v2847_v32 = vld [vmem:[%s3189_s30 + $0x60] sm:$0xf0] }
 0x116   : > { %1383 = vrot.lane.b32.xlu1 %v1351_v39, %s3105_s9  ;;  %v1517_v39 = vunpack.c.l.b16 %v2599_v29  ;;  %v1574_v26 = vshll.u32 %v4039_v22, 16  ;;  %v1572_v11 = vshrl.u32 %v4039_v22, 16  ;;  %v1983_v29 = vsel %vm1965_vm4, %v3792_v0, %v3924_v5 }
 0x117   : > { %v4007_v30 = vpop.permute.xlu2 %1235  ;;  %1375 = vrot.lane.b32.xlu0 %v1339_v50, %s3105_s9  ;;  %v1069_v13 = vrot.slane %v1067_v37, 1  ;;  %v1025_v50 = vpack.c.b16 %v1009_v14, %v1009_v14  ;;  %v1113_v45 = vor.u32 %v1112_v38, %v1108_v24 }
 0x118   : > { %v4010_v8 = vpop.permute.xlu1 %1243  ;;  %v4045_v42 = vpack.c.b16 %v1517_v39, %v1517_v39 }
 0x119   : > { %v4020_v40 = vpop.permute.xlu0 %1227  ;;  %v1070_v19 = vsel %vm521_vm0, %v1065_v47, %v1069_v13  ;;  %v1326_v44 = vrot.slane %v1025_v50, 1  ;;  %v1115_v52 = vshll.u32 %v1025_v50, 16  ;;  %v1991_v47 = vsel %vm1965_vm4, %v3810_v1, %v3861_v7  ;;  %v2603_v13 = vld [vmem:[%s3189_s30 + $0x68] sm:$0x1] }
 0x11a   : > { %v1579_v31 = vshll.u32 %v4045_v42, 16  ;;  %v2024_v14 = vsel %vm1998_vm6, %v1991_v47, %v3917_v21  ;;  %v2016_v21 = vsel %vm1998_vm6, %v1983_v29, %v4010_v8  ;;  %v1521_v5 = vunpack.c.l.b16 %v2603_v13  ;;  %v2829_v47 = vld [vmem:[%s3189_s30 + $0x90] sm:$0xf0] }
 0x11b   : > { %v1117_v27 = vrot.slane %v1115_v52, 1 }
 0x11c   : > { %v1581_v7 = vrot.slane %v1579_v31, 1 }
 0x11d   : > { %1767 = vrot.lane.b32.xlu2 %v1726_v28, %s3106_s10  ;;  %v1325_v28 = vrot.slane %v3004_v15, 1  ;;  %v1118_v0 = vsel %vm521_vm0, %v1113_v45, %v1117_v27 }
 0x11e   : > { %1759 = vrot.lane.b32.xlu1 %v1678_v12, %s3106_s10  ;;  %v1576_v12 = vrot.slane %v1574_v26, 1 }
 0x11f   : > { %v4029_v36 = vpop.permute.xlu2 %1467  ;;  %1495 = vrot.lane.b32.xlu0 %v3577_v6, %s3104_s8  ;;  %v1851_v6 = vsel %vm794_vm1, %v1849_v23, %v1850_v60  ;;  %v1327_v3 = vsel %vm794_vm1, %v1325_v28, %v1326_v44  ;;  %v2785_v23 = vld [vmem:[%s3189_s30 + $0x60] sm:$0xff]   ;;  %v1537_v28 = vpack.c.b16 %v1521_v5, %v1521_v5  ;;  %v4111_v5 = vld [vmem:[%s3189_s30 + $0xcc] sm:$0xff]  }
 0x120   : > { %v1380_v4 = vpop.permute.xlu1 %1379  ;;  %v1577_v1 = vor.u32 %v1576_v12, %v1572_v11  ;;  %v1622_v8 = vshll.u32 %v2785_v23, 16 }
 0x121   : > { %v1372_v49 = vpop.permute.xlu0 %1371  ;;  %v2057_v58 = vsel %vm2031_vm7, %v2024_v14, %v1380_v4  ;;  %v1627_v45 = vshll.u32 %v1537_v28, 16  ;;  %v1826_v14 = vrot.slane %v4045_v42, 1 }
 0x122   : > { %v2049_v39 = vsel %vm2031_vm7, %v2016_v21, %v1372_v49  ;;  %v2842_v49 = vld [vmem:[%s3189_s30 + $0x30] sm:$0xe]  ;;  %v1624_v12 = vrot.slane %v1622_v8, 1 }
 0x123   : > { %v2082_v44 = vsel %vm2064_vm8, %v2049_v39, %v3945_v25  ;;  %v2843_v34 = vor.u32 %v2842_v49, %v2841_v16  ;;  %v1620_v25 = vshrl.u32 %v2785_v23, 16 }
 0x125   : > { %1231 = vrot.lane.b32.xlu2 %v1070_v19, %s3103_s7  ;;  %v2848_v19 = vld [vmem:[%s3189_s30 + $0x60] sm:$0xe]  ;;  %v1825_v13 = vrot.slane %v2843_v34, 1 }
 0x126   : > { %1895 = vrot.lane.b32.xlu1 %v1863_v9, %s3107_s11  ;;  %v1582_v9 = vsel %vm521_vm0, %v1577_v1, %v1581_v7  ;;  %v2849_v24 = vor.u32 %v2848_v19, %v2847_v32  ;;  %v1629_v7 = vrot.slane %v1627_v45, 1 }
 0x127   : > { %v4050_v37 = vpop.permute.xlu2 %1747  ;;  %1887 = vrot.lane.b32.xlu0 %v1851_v6, %s3107_s11  ;;  %v2548_v6 = vld [vmem:[%s3189_s30 + $0xc8] sm:$0x1] }
 0x128   : > { %v1756_v59 = vpop.permute.xlu1 %1755  ;;  %v1018_v11 = vunpack.c.l.b16 %v2548_v6  ;;  %v1837_v31 = vrot.slane %v2849_v24, 1  ;;  %v2835_v6 = vld [vmem:[%s3189_s30 + $0xc0] sm:$0xf0] }
 0x129   : > { %v1492_v61 = vpop.permute.xlu0 %1491  ;;  %v2115_v38 = vsel %vm2097_vm9, %v2082_v44, %v1756_v59  ;;  %v2836_v44 = vld [vmem:[%s3189_s30 + $0xc0] sm:$0xe] }
 0x12a   : > { %v2090_v60 = vsel %vm2064_vm8, %v2057_v58, %v1492_v61  ;;  %v2830_v61 = vld [vmem:[%s3189_s30 + $0x90] sm:$0xe]  ;;  %v4102_v29 = vpack.c.b16 %v1018_v11, %v1018_v11  ;;  %v2837_v11 = vor.u32 %v2836_v44, %v2835_v6  ;;  %v3012_v44 = vld [vmem:[%s3189_s30 + $0xcc] sm:$0xe] }
 0x12b   : > { %v2123_v15 = vsel %vm2097_vm9, %v2090_v60, %v3976_v54  ;;  %v2544_v54 = vld [vmem:[%s3189_s30 + $0x98] sm:$0x1]  ;;  %v2831_v21 = vor.u32 %v2830_v61, %v2829_v47  ;;  %v1730_v47 = vshll.u32 %v4111_v5, 16 }
 0x12c   : > { %v1014_v59 = vunpack.c.l.b16 %v2544_v54  ;;  %v1223_v42 = vshll.u32 %v4102_v29, 16  ;;  %v1352_v61 = vrot.slane %v2837_v11, 1 }
 0x12d   : > { %1367 = vrot.lane.b32.xlu2 %v1327_v3, %s3105_s9  ;;  %v1838_v3 = vrot.slane %v1537_v28, 1  ;;  %v1340_v32 = vrot.slane %v2831_v21, 1 }
 0x12e   : > { %1359 = vrot.lane.b32.xlu1 %v1315_v55, %s3105_s9  ;;  %v1625_v55 = vor.u32 %v1624_v12, %v1620_v25  ;;  %v1225_v16 = vrot.slane %v1223_v42, 1 }
 0x12f   : > { %v4076_v4 = vpop.permute.xlu2 %1245  ;;  %1239 = vrot.lane.b32.xlu0 %v1118_v0, %s3103_s7  ;;  %v1839_v1 = vsel %vm794_vm1, %v1837_v31, %v1838_v3  ;;  %v1827_v0 = vsel %vm794_vm1, %v1825_v13, %v1826_v14  ;;  %v2000_v3 = vsel %vm1998_vm6, %v3746_v53, %v4020_v40  ;;  %v1353_v14 = vrot.slane %v4102_v29, 1 }
 0x130   : > { %v1892_v50 = vpop.permute.xlu1 %1891  ;;  %v1630_v39 = vsel %vm521_vm0, %v1625_v55, %v1629_v7  ;;  %v1226_v34 = vsel %vm521_vm0, %v4001_v56, %v1225_v16  ;;  %v2540_v56 = vld [vmem:[%s3189_s30 + $0x68] sm:$0x1]  ;;  %v1732_v29 = vrot.slane %v1730_v47, 1 }
 0x131   : > { %v2156_v26 = vsel %vm2130_vm10, %v2123_v15, %v1892_v50  ;;  %v1884_v52 = vpop.permute.xlu0 %1883  ;;  %v4118_v50 = vld [vmem:[%s3189_s30 + $0x9c] sm:$0xff]   ;;  %v1010_v21 = vunpack.c.l.b16 %v2540_v56 }
 0x132   : > { %2657 = vmatmul.msk.bf16.vlgmr.msra.gmra.mxu3 %vm2203_vm11, %v2156_v26  ;;  %v2148_v51 = vsel %vm2130_vm10, %v2115_v38, %v1884_v52  ;;  %v3008_v15 = vld [vmem:[%s3189_s30 + $0x9c] sm:$0xf0]  ;;  %v2612_v26 = vld [vmem:[%s3189_s30 + $0xd4] sm:$0x1]  ;;  %v2608_v38 = vld [vmem:[%s3189_s30 + $0xa4] sm:$0x1]  ;;  %v2008_v52 = vsel %vm1998_vm6, %v3903_v46, %v4007_v30 }
 0x133   : > { %2653 = vmatmul.msk.bf16.vlgmr.msra.gmra.mxu2 %vm2203_vm11, %v2148_v51  ;;  %v3009_v51 = vld [vmem:[%s3189_s30 + $0x9c] sm:$0xe]  ;;  %v1530_v25 = vunpack.c.l.b16 %v2612_v26  ;;  %v1526_v31 = vunpack.c.l.b16 %v2608_v38  ;;  %v4171_v6 = vpack.c.b16 %v1010_v21, %v1010_v21  ;;  %v2824_v56 = vld [vmem:[%s3189_s30 + $0x60] sm:$0xe]  ;;  %v2818_v21 = vld [vmem:[%s3189_s30 + $0x30] sm:$0xe] }
 0x135   : > { %1743 = vrot.lane.b32.xlu2 %v1582_v9, %s3106_s10  ;;  %v4150_v13 = vpack.c.b16 %v1530_v25, %v1530_v25  ;;  %v1542_v55 = vpack.c.b16 %v1526_v31, %v1526_v31  ;;  %v4190_v31 = vld [vmem:[%s3189_s30 + $0x3c] sm:$0xf0] }
 0x136   : > { %1479 = vrot.lane.b32.xlu1 %v2785_v23, %s3104_s8  ;;  %v1030_v23 = vpack.c.b16 %v1014_v59, %v1014_v59 }
 0x137   : > { %v4097_v27 = vpop.permute.xlu2 %1381  ;;  %1471 = vrot.lane.b32.xlu0 %v4039_v22, %s3104_s8  ;;  %v4114_v22 = vld [vmem:[%s3189_s30 + $0xcc] sm:$0xf0]  ;;  %v1853_v16 = vrot.slane %v1542_v55, 1 }
 0x138   : > { %v1364_v58 = vpop.permute.xlu1 %1363  ;;  %v1341_v19 = vrot.slane %v1030_v23, 1  ;;  %v1175_v8 = vshll.u32 %v1030_v23, 16  ;;  %v3010_v23 = vor.u32 %v3009_v51, %v3008_v15 }
 0x139   : > { %v1356_v60 = vpop.permute.xlu0 %1355  ;;  %v2041_v12 = vsel %vm2031_vm7, %v2008_v52, %v1364_v58  ;;  %v2536_v58 = vld [vmem:[%s3189_s30 + $0x38] sm:$0x1] }
 0x13a   : > { %v1342_v28 = vsel %vm794_vm1, %v1340_v32, %v1341_v19  ;;  %v1177_v24 = vrot.slane %v1175_v8, 1  ;;  %v2033_v30 = vsel %vm2031_vm7, %v2000_v3, %v1356_v60  ;;  %v1006_v32 = vunpack.c.l.b16 %v2536_v58 }
 0x13b   : > { %v1680_v19 = vshrl.u32 %v4118_v50, 16  ;;  %v1852_v15 = vrot.slane %v3010_v23, 1  ;;  %v2817_v23 = vld [vmem:[%s3189_s30 + $0x30] sm:$0xf0] }
 0x13c   : > { %v1178_v46 = vsel %vm521_vm0, %v3397_v18, %v1177_v24  ;;  %v1682_v18 = vshll.u32 %v4118_v50, 16  ;;  %v4176_v24 = vpack.c.b16 %v1006_v32, %v1006_v32 }
 0x13d   : > { %1879 = vrot.lane.b32.xlu2 %v1839_v1, %s3107_s11  ;;  %v2066_v1 = vsel %vm2064_vm8, %v2033_v30, %v4029_v36  ;;  %v1354_v36 = vsel %vm794_vm1, %v1352_v61, %v1353_v14  ;;  %v2823_v30 = vld [vmem:[%s3189_s30 + $0x60] sm:$0xf0]  ;;  %v4198_v61 = vld [vmem:[%s3189_s30 + $0x6c] sm:$0xff]  }
 0x13e   : > { %1871 = vrot.lane.b32.xlu1 %v1827_v0, %s3107_s11  ;;  %v1684_v8 = vrot.slane %v1682_v18, 1  ;;  %v1079_v25 = vshll.u32 %v4176_v24, 16  ;;  %v2600_v18 = vld [vmem:[%s3189_s30 + $0x44] sm:$0x1]  ;;  %v4459_v14 = vld [vmem:[#allocation6_spill] sm:$0xff] }
 0x13f   : > { %v4122_v9 = vpop.permute.xlu2 %1757  ;;  %1751 = vrot.lane.b32.xlu0 %v1630_v39, %s3106_s10  ;;  %v1735_v39 = vshll.u32 %v4150_v13, 16 }
 0x140   : > { %v1740_v49 = vpop.permute.xlu1 %1739  ;;  %v1685_v38 = vor.u32 %v1684_v8, %v1680_v19  ;;  %v1081_v47 = vrot.slane %v1079_v25, 1  ;;  %v2819_v8 = vor.u32 %v2818_v21, %v2817_v23 }
 0x141   : > { %v1476_v54 = vpop.permute.xlu0 %1475  ;;  %v2099_v60 = vsel %vm2097_vm9, %v2066_v1, %v1740_v49  ;;  %v1687_v49 = vshll.u32 %v1542_v55, 16  ;;  %v2825_v1 = vor.u32 %v2824_v56, %v2823_v30 }
 0x142   : > { %v2074_v45 = vsel %vm2064_vm8, %v2041_v12, %v1476_v54  ;;  %v1854_v54 = vsel %vm794_vm1, %v1852_v15, %v1853_v16  ;;  %v4187_v12 = vld [vmem:[%s3189_s30 + $0x3c] sm:$0xff]  }
 0x143   : > { %v2107_v40 = vsel %vm2097_vm9, %v2074_v45, %v4050_v37  ;;  %v1728_v37 = vshrl.u32 %v4111_v5, 16  ;;  %v1689_v51 = vrot.slane %v1687_v49, 1  ;;  %v1328_v19 = vrot.slane %v2825_v1, 1 }
 0x144   : > { %v1586_v49 = vshll.u32 %v4187_v12, 16 }
 0x145   : > { %1377 = vrot.lane.b32.xlu2 %v1342_v28, %s3105_s9  ;;  %v1733_v26 = vor.u32 %v1732_v29, %v1728_v37  ;;  %v1737_v28 = vrot.slane %v1735_v39, 1  ;;  %v1690_v3 = vsel %vm521_vm0, %v1685_v38, %v1689_v51  ;;  %v4460_v37 = vld [vmem:[#allocation5_spill] sm:$0xff]  ;;  %v1518_v29 = vunpack.c.l.b16 %v2600_v18  ;;  %v2604_v39 = vld [vmem:[%s3189_s30 + $0x74] sm:$0x1] }
 0x146   : > { %1257 = vrot.lane.b32.xlu1 %v1226_v34, %s3103_s7  ;;  %v1522_v15 = vunpack.c.l.b16 %v2604_v39  ;;  %v1316_v38 = vrot.slane %v2819_v8, 1  ;;  %v1588_v25 = vrot.slane %v1586_v49, 1 }
 0x147   : > { %v4147_v59 = vpop.permute.xlu2 %1893  ;;  %1249 = vrot.lane.b32.xlu0 %v1178_v46, %s3103_s7  ;;  %v1738_v11 = vsel %vm521_vm0, %v1733_v26, %v1737_v28  ;;  %v3013_v46 = vor.u32 %v3012_v44, %v4114_v22  ;;  %v1865_v22 = vrot.slane %v4150_v13, 1  ;;  %v1534_v16 = vpack.c.b16 %v1518_v29, %v1518_v29 }
 0x148   : > { %v1876_v53 = vpop.permute.xlu1 %1875  ;;  %v1634_v28 = vshll.u32 %v4198_v61, 16 }
 0x149   : > { %v2140_v7 = vsel %vm2130_vm10, %v2107_v40, %v1876_v53  ;;  %v1868_v0 = vpop.permute.xlu0 %1867  ;;  %v4201_v53 = vld [vmem:[%s3189_s30 + $0x6c] sm:$0xf0]  ;;  %v1864_v58 = vrot.slane %v3013_v46, 1  ;;  %v1829_v39 = vrot.slane %v1534_v16, 1 }
 0x14a   : > { %2649 = vmatmul.msk.bf16.vlgmr.msra.gmra.mxu1 %vm2203_vm11, %v2140_v7  ;;  %v2132_v42 = vsel %vm2130_vm10, %v2099_v60, %v1868_v0  ;;  %v2018_v60 = vsel %vm1998_vm6, %v3828_v10, %v4076_v4  ;;  %v1329_v4 = vrot.slane %v4171_v6, 1  ;;  %v1636_v46 = vrot.slane %v1634_v28, 1 }
 0x14b   : > { %2645 = vmatmul.msk.bf16.vlgmr.msra.gmra.mxu0 %vm2203_vm11, %v2132_v42  ;;  %v1082_v42 = vsel %vm521_vm0, %v4460_v37, %v1081_v47 }
 0x14d   : > { %1497 = vrot.lane.b32.xlu2 %v4111_v5, %s3104_s8 }
 0x14e   : > { %1489 = vrot.lane.b32.xlu1 %v4118_v50, %s3104_s8  ;;  %v1127_v50 = vshll.u32 %v4171_v6, 16  ;;  %v1317_v6 = vrot.slane %v4176_v24, 1  ;;  %v1632_v24 = vshrl.u32 %v4198_v61, 16 }
 0x14f   : > { %1385 = vrot.lane.b32.xlu0 %v1354_v36, %s3105_s9  ;;  %v4179_v52 = vpop.permute.xlu2 %1357  ;;  %v1866_v36 = vsel %vm794_vm1, %v1864_v58, %v1865_v22 }
 0x150   : > { %v1374_v5 = vpop.permute.xlu1 %1373  ;;  %v1129_v45 = vrot.slane %v1127_v50, 1  ;;  %v1330_v50 = vsel %vm794_vm1, %v1328_v19, %v1329_v4  ;;  %v1318_v47 = vsel %vm794_vm1, %v1316_v38, %v1317_v6  ;;  %v1637_v18 = vor.u32 %v1636_v46, %v1632_v24 }
 0x151   : > { %v1254_v34 = vpop.permute.xlu0 %1253  ;;  %v2051_v32 = vsel %vm2031_vm7, %v2018_v60, %v1374_v5 }
 0x152   : > { %v1130_v55 = vsel %vm521_vm0, %v4459_v14, %v1129_v45  ;;  %v2026_v10 = vsel %vm1998_vm6, %v3995_v41, %v1254_v34  ;;  %v3015_v45 = vld [vmem:[%s3189_s30 + $0x6c] sm:$0xe] }
 0x153   : > { %v2059_v41 = vsel %vm2031_vm7, %v2026_v10, %v4097_v27  ;;  %v1591_v27 = vshll.u32 %v1534_v16, 16 }
 0x155   : > { %1889 = vrot.lane.b32.xlu2 %v1854_v54, %s3107_s11 }
 0x156   : > { %1769 = vrot.lane.b32.xlu1 %v1738_v11, %s3106_s10  ;;  %v1584_v11 = vshrl.u32 %v4187_v12, 16 }
 0x157   : > { %1761 = vrot.lane.b32.xlu0 %v1690_v3, %s3106_s10  ;;  %v4213_v0 = vpop.permute.xlu2 %1477 }
 0x158   : > { %v1494_v40 = vpop.permute.xlu1 %1493 }
 0x159   : > { %v1486_v7 = vpop.permute.xlu0 %1485  ;;  %v2092_v54 = vsel %vm2064_vm8, %v2059_v41, %v1494_v40  ;;  %v3018_v40 = vld [vmem:[%s3189_s30 + $0x3c] sm:$0xe]  ;;  %s185_s30 = sand.u32 1, %s3082_s13  }
 0x15a   : > { %v2084_v13 = vsel %vm2064_vm8, %v2051_v32, %v1486_v7  ;;  %v3016_v7 = vor.u32 %v3015_v45, %v4201_v53  ;;  %v3019_v23 = vor.u32 %v3018_v40, %v4190_v31 }
 0x15b   : > { %v2117_v26 = vsel %vm2097_vm9, %v2084_v13, %v4122_v9  ;;  %v1538_v9 = vpack.c.b16 %v1522_v15, %v1522_v15 }
 0x15c   : > { %v1840_v60 = vrot.slane %v3016_v7, 1  ;;  %v1828_v29 = vrot.slane %v3019_v23, 1 }
 0x15d   : > { %1241 = vrot.lane.b32.xlu2 %v1130_v55, %s3103_s7  ;;  %v1639_v30 = vshll.u32 %v1538_v9, 16  ;;  %v1589_v55 = vor.u32 %v1588_v25, %v1584_v11  ;;  %v1841_v37 = vrot.slane %v1538_v9, 1 }
 0x15e   : > { %1233 = vrot.lane.b32.xlu1 %v1082_v42, %s3103_s7  ;;  %v1830_v53 = vsel %vm794_vm1, %v1828_v29, %v1829_v39 }
 0x15f   : > { %1897 = vrot.lane.b32.xlu0 %v1866_v36, %s3107_s11  ;;  %v1870_v56 = vpop.permute.xlu2 %1869  ;;  %v1641_v14 = vrot.slane %v1639_v30, 1  ;;  %v1842_v13 = vsel %vm794_vm1, %v1840_v60, %v1841_v37 }
 0x160   : > { %v1886_v44 = vpop.permute.xlu1 %1885 }
 0x161   : > { %v2150_v5 = vsel %vm2130_vm10, %v2117_v26, %v1886_v44  ;;  %v1766_v51 = vpop.permute.xlu0 %1765 }
 0x162   : > { %2654 = vmatmul.msk.bf16.gmra.mxu2 %vm2203_vm11, %v2150_v5  ;;  %v2125_v34 = vsel %vm2097_vm9, %v2092_v54, %v1766_v51 }
 0x163   : > { %v2158_v3 = vsel %vm2130_vm10, %v2125_v34, %v4147_v59  ;;  %v1593_v59 = vrot.slane %v1591_v27, 1 }
 0x164   : > { %2658 = vmatmul.msk.bf16.gmra.mxu3 %vm2203_vm11, %v2158_v3 }
 0x165   : > { %1473 = vrot.lane.b32.xlu2 %v4187_v12, %s3104_s8  ;;  %v1642_v12 = vsel %vm521_vm0, %v1637_v18, %v1641_v14  ;;  %v1594_v1 = vsel %vm521_vm0, %v1589_v55, %v1593_v59 }
 0x166   : > { %1369 = vrot.lane.b32.xlu1 %v1330_v50, %s3105_s9 }
 0x167   : > { %1361 = vrot.lane.b32.xlu0 %v1318_v47, %s3105_s9  ;;  %v1256_v21 = vpop.permute.xlu2 %1255  ;;  %s2499_s9 = sshll.u32 %s185_s30, 8 }
 0x168   : > { %v1238_v58 = vpop.permute.xlu1 %1237  ;;  %v2028_v51 = vsel %vm1998_vm6, %v3989_v17, %v1256_v21  ;;  %v4308_v21 = vld [vmem:[%s4451_s2] ss:$0 sm:$0xff] }
 0x169   : > { %v1230_v22 = vpop.permute.xlu0 %1229  ;;  %v2010_v16 = vsel %vm1998_vm6, %v3896_v48, %v1238_v58 }
 0x16a   : > { %v2002_v36 = vsel %vm1998_vm6, %v3876_v20, %v1230_v22 }
 0x16d   : > { %1753 = vrot.lane.b32.xlu2 %v1642_v12, %s3106_s10 }
 0x16e   : > { %1745 = vrot.lane.b32.xlu1 %v1594_v1, %s3106_s10  ;;  %s4317_s10 = scalar_lea.vmem [#allocation2], %s2499_s9 }
 0x16f   : > { %1481 = vrot.lane.b32.xlu0 %v4198_v61, %s3104_s8  ;;  %v1488_v19 = vpop.permute.xlu2 %1487  ;;  %v2035_v61 = vsel %vm2031_vm7, %v2002_v36, %v4179_v52  ;;  %s2409_s23 = sshll.u32 %s4317_s10, 4  ;;  %s2410_s23 = int_to_ptr.vmem [resolvable:$true] %s2409_s23 }
 0x170   : > { %v1470_v42 = vpop.permute.xlu1 %1469 }
 0x171   : > { %v1366_v32 = vpop.permute.xlu0 %1365  ;;  %v2068_v8 = vsel %vm2064_vm8, %v2035_v61, %v1470_v42 }
 0x172   : > { %v2043_v20 = vsel %vm2031_vm7, %v2010_v16, %v1366_v32 }
 0x173   : > { %v2076_v44 = vsel %vm2064_vm8, %v2043_v20, %v4213_v0 }
 0x176   : > { %1881 = vrot.lane.b32.xlu1 %v1842_v13, %s3107_s11 }
 0x177   : > { %1873 = vrot.lane.b32.xlu0 %v1830_v53, %s3107_s11  ;;  %v1768_v28 = vpop.permute.xlu2 %1767  ;;  %s2670_s11 = sshll.u32 %s3090_s15, 8  ;;  %s2394_s15 = scalar_lea.sflag [#allocation3], %s185_s30 }
 0x178   : > { %v1750_v31 = vpop.permute.xlu1 %1749  ;;  %s2408_s21 = scalar_lea.hbm %s4452_s3, %s2670_s11 }
 0x179   : > { %v1742_v10 = vpop.permute.xlu0 %1741  ;;  %v2109_v52 = vsel %vm2097_vm9, %v2076_v44, %v1750_v31  ;;  %s2411_s26 = sshll.u32 %s2408_s21, 4  ;;  %s2412_s26 = int_to_ptr.hbm [resolvable:$true] %s2411_s26 }
 0x17a   : > { %v2101_v4 = vsel %vm2097_vm9, %v2068_v8, %v1742_v10  ;;  %s3034_s27 = sshra.s32 %s2412_s26, 4  ;;  %s3035_s27 = int_to_ptr.hbm [resolvable:$true] %s3034_s27 }
 0x17b   : > { %v2134_v15 = vsel %vm2130_vm10, %v2101_v4, %v1870_v56  ;;  %s3036_s28 = scalar_lea.hbm %s3035_s27, 256  ;;  %p3041_p1 = scmp.lt.s32.totalorder %s3035_s27, %s4452_s3 }
 0x17c   : > { %2646 = vmatmul.msk.bf16.gmra.mxu0 %vm2203_vm11, %v2134_v15  ;;  %p3037_p12 = scmp.ne.s32.totalorder %s3035_s27, %s3036_s28  ;;  %p3042_p2 = scmp.lt.s32.totalorder %s3040_s6, %s3036_s28 }
 0x17e   : > { %p3038_p13 = pnand %p3037_p12, %p3169_p4  ;;  %p3043_p3 = por %p3042_p2, %p3041_p1 }
 0x17f   : > { %v1232_v6 = vpop.permute.xlu2 %1231 }
 0x180   : > { %v1248_v49 = vpop.permute.xlu1 %1247  ;;  %v2004_v18 = vsel %vm1998_vm6, %v3867_v35, %v1232_v6  ;;  %p3039_p0 = pneg %p3038_p13 }
 0x181   : > { %v1878_v26 = vpop.permute.xlu0 %1877  ;;  %v2020_v0 = vsel %vm1998_vm6, %v3961_v2, %v1248_v49 }
 0x182   : > { %v2142_v41 = vsel %vm2130_vm10, %v2109_v52, %v1878_v26  ;;  %p3044_p5 = pnand %p3043_p3, %p3039_p0 }
 0x183   : > { %2650 = vmatmul.msk.bf16.gmra.mxu1 %vm2203_vm11, %v2142_v41 }
 0x187   : > { %v1368_v11 = vpop.permute.xlu2 %1367 }
 0x188   : > { %v1384_v5 = vpop.permute.xlu1 %1383 }
 0x189   : > { %v1376_v38 = vpop.permute.xlu0 %1375  ;;  %v2061_v50 = vsel %vm2031_vm7, %v2028_v51, %v1384_v5 }
 0x18a   : > { %v2053_v34 = vsel %vm2031_vm7, %v2020_v0, %v1376_v38 }
 0x18b   : > { %v2086_v3 = vsel %vm2064_vm8, %v2053_v34, %v1488_v19 }
 0x18f   : > { %v1744_v30 = vpop.permute.xlu2 %1743 }
 0x190   : > { %v1760_v48 = vpop.permute.xlu1 %1759 }
 0x191   : > { %v1496_v54 = vpop.permute.xlu0 %1495  ;;  %v2119_v24 = vsel %vm2097_vm9, %v2086_v3, %v1760_v48 }
 0x192   : > { %v2094_v9 = vsel %vm2064_vm8, %v2061_v50, %v1496_v54 }
 0x193   : > { %v2127_v27 = vsel %vm2097_vm9, %v2094_v9, %v1768_v28 }
 0x197   : > { %v1880_v14 = vpop.permute.xlu2 %1879 }
 0x198   : > { %v1896_v25 = vpop.permute.xlu1 %1895 }
 0x199   : > { %v2160_v45 = vsel %vm2130_vm10, %v2127_v27, %v1896_v25  ;;  %v1888_v17 = vpop.permute.xlu0 %1887 }
 0x19a   : > { %2659 = vmatmul.msk.bf16.gmra.mxu3 %vm2203_vm11, %v2160_v45  ;;  %v2152_v46 = vsel %vm2130_vm10, %v2119_v24, %v1888_v17 }
 0x19b   : > { %2655 = vmatmul.msk.bf16.gmra.mxu2 %vm2203_vm11, %v2152_v46 }
 0x19f   : > { %v1378_v37 = vpop.permute.xlu2 %1377 }
 0x1a0   : > { %v1360_v2 = vpop.permute.xlu1 %1359 }
 0x1a1   : > { %v1240_v56 = vpop.permute.xlu0 %1239  ;;  %v2037_v55 = vsel %vm2031_vm7, %v2004_v18, %v1360_v2 }
 0x1a2   : > { %v2012_v58 = vsel %vm1998_vm6, %v3801_v62, %v1240_v56 }
 0x1a3   : > { %v2045_v1 = vsel %vm2031_vm7, %v2012_v58, %v1368_v11 }
 0x1a7   : > { %v1498_v8 = vpop.permute.xlu2 %1497 }
 0x1a8   : > { %v1480_v47 = vpop.permute.xlu1 %1479 }
 0x1a9   : > { %v1472_v40 = vpop.permute.xlu0 %1471  ;;  %v2078_v23 = vsel %vm2064_vm8, %v2045_v1, %v1480_v47 }
 0x1aa   : > { %v2070_v59 = vsel %vm2064_vm8, %v2037_v55, %v1472_v40 }
 0x1ab   : > { %v2103_v22 = vsel %vm2097_vm9, %v2070_v59, %v1744_v30 }
 0x1af   : > { %v1890_v41 = vpop.permute.xlu2 %1889 }
 0x1b0   : > { %v1872_v12 = vpop.permute.xlu1 %1871 }
 0x1b1   : > { %v2136_v7 = vsel %vm2130_vm10, %v2103_v22, %v1872_v12  ;;  %v1752_v35 = vpop.permute.xlu0 %1751 }
 0x1b2   : > { %2647 = vmatmul.msk.bf16.gmra.mxu0 %vm2203_vm11, %v2136_v7  ;;  %v2111_v62 = vsel %vm2097_vm9, %v2078_v23, %v1752_v35 }
 0x1b3   : > { %v2144_v60 = vsel %vm2130_vm10, %v2111_v62, %v1880_v14 }
 0x1b4   : > { %2651 = vmatmul.msk.bf16.gmra.mxu1 %vm2203_vm11, %v2144_v60 }
 0x1b5   : > { %v2309_v42 = vpop.f32.mrf.mxu3 }
 0x1b6   : > { %v2310_v29 = vadd.f32 %v4308_v21, %v2309_v42  ;;  %v2289_v39 = vpop.f32.mrf.mxu2 }
 0x1b7   : > { %v2290_v32 = vadd.f32 %v4308_v21, %v2289_v39  ;;  %v1242_v2 = vpop.permute.xlu2 %1241 }
 0x1b8   : > { %v2353_v13 = vmax.f32 %v2310_v29, 0.0  ;;  %v1258_v53 = vpop.permute.xlu1 %1257  ;;  %v2014_v59 = vsel %vm1998_vm6, %v3932_v57, %v1242_v2 }
 0x1b9   : > { %v2345_v36 = vmax.f32 %v2290_v32, 0.0  ;;  %v1250_v31 = vpop.permute.xlu0 %1249  ;;  %v2030_v9 = vsel %vm1998_vm6, %v3889_v43, %v1258_v53 }
 0x1ba   : > { %2385 = vst [vmem:[%s4317_s10 + $0xc0] sm:$0xff] %v2353_v13  ;;  %v2022_v44 = vsel %vm1998_vm6, %v3956_v63, %v1250_v31 }
 0x1bb   : > { %2377 = vst [vmem:[%s4317_s10 + $0x80] sm:$0xff] %v2345_v36  ;;  %v2055_v5 = vsel %vm2031_vm7, %v2022_v44, %v1378_v37 }
 0x1bd   : > { %v2311_v19 = vpop.f32.mrf.mxu3 }
 0x1be   : > { %v2312_v61 = vadd.f32 %v4308_v21, %v2311_v19  ;;  %v2291_v10 = vpop.f32.mrf.mxu2 }
 0x1bf   : > { %v2292_v4 = vadd.f32 %v4308_v21, %v2291_v10  ;;  %v1474_v18 = vpop.permute.xlu2 %1473 }
 0x1c0   : > { %v2354_v15 = vmax.f32 %v2312_v61, 0.0  ;;  %v1490_v16 = vpop.permute.xlu1 %1489 }
 0x1c1   : > { %v2346_v20 = vmax.f32 %v2292_v4, 0.0  ;;  %v1386_v49 = vpop.permute.xlu0 %1385  ;;  %v2088_v6 = vsel %vm2064_vm8, %v2055_v5, %v1490_v16 }
 0x1c2   : > { %2386 = vst [vmem:[%s4317_s10 + $0xc8] sm:$0xff] %v2354_v15  ;;  %v2063_v34 = vsel %vm2031_vm7, %v2030_v9, %v1386_v49 }
 0x1c3   : > { %2378 = vst [vmem:[%s4317_s10 + $0x88] sm:$0xff] %v2346_v20  ;;  %v2096_v3 = vsel %vm2064_vm8, %v2063_v34, %v1498_v8 }
 0x1c7   : > { %v2269_v52 = vpop.f32.mrf.mxu1  ;;  %v1754_v1 = vpop.permute.xlu2 %1753 }
 0x1c8   : > { %v2270_v26 = vadd.f32 %v4308_v21, %v2269_v52  ;;  %v1770_v28 = vpop.permute.xlu1 %1769  ;;  %v2249_v38 = vpop.f32.mrf.mxu0 }
 0x1c9   : > { %v2250_v48 = vadd.f32 %v4308_v21, %v2249_v38  ;;  %v1762_v51 = vpop.permute.xlu0 %1761  ;;  %v2129_v24 = vsel %vm2097_vm9, %v2096_v3, %v1770_v28 }
 0x1ca   : > { %v2337_v54 = vmax.f32 %v2270_v26, 0.0  ;;  %v2121_v50 = vsel %vm2097_vm9, %v2088_v6, %v1762_v51 }
 0x1cb   : > { %v2329_v0 = vmax.f32 %v2250_v48, 0.0  ;;  %v2154_v63 = vsel %vm2130_vm10, %v2121_v50, %v1890_v41 }
 0x1cc   : > { %2369 = vst [vmem:[%s4317_s10 + $0x40] sm:$0xff] %v2337_v54  ;;  %2656 = vmatmul.msk.bf16.gmra.mxu2 %vm2203_vm11, %v2154_v63 }
 0x1cd   : > { %2361 = vst [vmem:[%s4317_s10] sm:$0xff] %v2329_v0 }
 0x1cf   : > { %v2271_v11 = vpop.f32.mrf.mxu1 }
 0x1d0   : > { %v2272_v25 = vadd.f32 %v4308_v21, %v2271_v11  ;;  %v1234_v27 = vpop.permute.xlu1 %1233  ;;  %v2251_v45 = vpop.f32.mrf.mxu0 }
 0x1d1   : > { %v2252_v17 = vadd.f32 %v4308_v21, %v2251_v45  ;;  %v1898_v43 = vpop.permute.xlu0 %1897  ;;  %v2006_v12 = vsel %vm1998_vm6, %v3778_v33, %v1234_v27 }
 0x1d2   : > { %v2338_v46 = vmax.f32 %v2272_v25, 0.0  ;;  %v2162_v30 = vsel %vm2130_vm10, %v2129_v24, %v1898_v43 }
 0x1d3   : > { %v2330_v56 = vmax.f32 %v2252_v17, 0.0  ;;  %2660 = vmatmul.msk.bf16.gmra.mxu3 %vm2203_vm11, %v2162_v30 }
 0x1d4   : > { %2370 = vst [vmem:[%s4317_s10 + $0x48] sm:$0xff] %v2338_v46 }
 0x1d5   : > { %2362 = vst [vmem:[%s4317_s10 + $0x8] sm:$0xff] %v2330_v56 }
 0x1d8   : > { %v1370_v47 = vpop.permute.xlu1 %1369 }
 0x1d9   : > { %v1362_v40 = vpop.permute.xlu0 %1361  ;;  %v2047_v58 = vsel %vm2031_vm7, %v2014_v59, %v1370_v47 }
 0x1da   : > { %v2039_v23 = vsel %vm2031_vm7, %v2006_v12, %v1362_v40 }
 0x1db   : > { %v2072_v42 = vsel %vm2064_vm8, %v2039_v23, %v1474_v18 }
 0x1e0   : > { %v1746_v14 = vpop.permute.xlu1 %1745 }
 0x1e1   : > { %v1482_v55 = vpop.permute.xlu0 %1481  ;;  %v2105_v39 = vsel %vm2097_vm9, %v2072_v42, %v1746_v14 }
 0x1e2   : > { %v2080_v22 = vsel %vm2064_vm8, %v2047_v58, %v1482_v55 }
 0x1e3   : > { %v2113_v62 = vsel %vm2097_vm9, %v2080_v22, %v1754_v1 }
 0x1e5   : > { %v2294_v7 = vpop.f32.mrf.mxu2 }
 0x1e6   : > { %v2295_v35 = vadd.f32 %v4308_v21, %v2294_v7 }
 0x1e7   : > { %v2314_v37 = vpop.f32.mrf.mxu3 }
 0x1e8   : > { %v2347_v60 = vmax.f32 %v2295_v35, 0.0  ;;  %v1882_v57 = vpop.permute.xlu1 %1881  ;;  %v2315_v29 = vadd.f32 %v4308_v21, %v2314_v37 }
 0x1e9   : > { %v2146_v33 = vsel %vm2130_vm10, %v2113_v62, %v1882_v57  ;;  %v1874_v32 = vpop.permute.xlu0 %1873 }
 0x1ea   : > { %2379 = vst [vmem:[%s4317_s10 + $0x90] sm:$0xff] %v2347_v60  ;;  %2652 = vmatmul.msk.bf16.gmra.mxu1 %vm2203_vm11, %v2146_v33  ;;  %v2355_v13 = vmax.f32 %v2315_v29, 0.0  ;;  %v2138_v53 = vsel %vm2130_vm10, %v2105_v39, %v1874_v32 }
 0x1eb   : > { %2648 = vmatmul.msk.bf16.gmra.mxu0 %vm2203_vm11, %v2138_v53 }
 0x1ec   : > { %2387 = vst [vmem:[%s4317_s10 + $0xd0] sm:$0xff] %v2355_v13 }
 0x1ed   : > { %v2296_v36 = vpop.f32.mrf.mxu2 }
 0x1ee   : > { %v2297_v31 = vadd.f32 %v4308_v21, %v2296_v36 }
 0x1ef   : > { %v2316_v61 = vpop.f32.mrf.mxu3 }
 0x1f0   : > { %v2348_v19 = vmax.f32 %v2297_v31, 0.0  ;;  %v2317_v8 = vadd.f32 %v4308_v21, %v2316_v61 }
 0x1f2   : > { %2380 = vst [vmem:[%s4317_s10 + $0x98] sm:$0xff] %v2348_v19  ;;  %v2356_v10 = vmax.f32 %v2317_v8, 0.0 }
 0x1f4   : > { %2388 = vst [vmem:[%s4317_s10 + $0xd8] sm:$0xff] %v2356_v10 }
 0x1f9   : > { %v2254_v4 = vpop.f32.mrf.mxu0 }
 0x1fa   : > { %v2255_v15 = vadd.f32 %v4308_v21, %v2254_v4 }
 0x1fc   : > { %v2331_v16 = vmax.f32 %v2255_v15, 0.0 }
 0x1fe   : > { %2363 = vst [vmem:[%s4317_s10 + $0x10] sm:$0xff] %v2331_v16 }
 0x200   : > { %v2274_v20 = vpop.f32.mrf.mxu1 }
 0x201   : > { %v2275_v49 = vadd.f32 %v4308_v21, %v2274_v20  ;;  %v2256_v44 = vpop.f32.mrf.mxu0 }
 0x202   : > { %v2257_v52 = vadd.f32 %v4308_v21, %v2256_v44 }
 0x203   : > { %v2339_v26 = vmax.f32 %v2275_v49, 0.0 }
 0x204   : > { %v2332_v28 = vmax.f32 %v2257_v52, 0.0 }
 0x205   : > { %2371 = vst [vmem:[%s4317_s10 + $0x50] sm:$0xff] %v2339_v26 }
 0x206   : > { %2364 = vst [vmem:[%s4317_s10 + $0x18] sm:$0xff] %v2332_v28 }
 0x208   : > { %v2276_v41 = vpop.f32.mrf.mxu1 }
 0x209   : > { %v2277_v5 = vadd.f32 %v4308_v21, %v2276_v41 }
 0x20b   : > { %v2340_v38 = vmax.f32 %v2277_v5, 0.0 }
 0x20d   : > { %2372 = vst [vmem:[%s4317_s10 + $0x58] sm:$0xff] %v2340_v38 }
 0x21d   : > { %v2319_v6 = vpop.f32.mrf.mxu3 }
 0x21e   : > { %v2320_v48 = vadd.f32 %v4308_v21, %v2319_v6  ;;  %v2299_v54 = vpop.f32.mrf.mxu2 }
 0x21f   : > { %v2300_v51 = vadd.f32 %v4308_v21, %v2299_v54 }
 0x220   : > { %v2357_v50 = vmax.f32 %v2320_v48, 0.0 }
 0x221   : > { %v2349_v0 = vmax.f32 %v2300_v51, 0.0 }
 0x222   : > { %2389 = vst [vmem:[%s4317_s10 + $0xe0] sm:$0xff] %v2357_v50 }
 0x223   : > { %2381 = vst [vmem:[%s4317_s10 + $0xa0] sm:$0xff] %v2349_v0 }
 0x225   : > { %v2321_v63 = vpop.f32.mrf.mxu3 }
 0x226   : > { %v2322_v9 = vadd.f32 %v4308_v21, %v2321_v63  ;;  %v2301_v34 = vpop.f32.mrf.mxu2 }
 0x227   : > { %v2302_v11 = vadd.f32 %v4308_v21, %v2301_v34 }
 0x228   : > { %v2358_v25 = vmax.f32 %v2322_v9, 0.0 }
 0x229   : > { %v2350_v27 = vmax.f32 %v2302_v11, 0.0 }
 0x22a   : > { %2390 = vst [vmem:[%s4317_s10 + $0xe8] sm:$0xff] %v2358_v25 }
 0x22b   : > { %2382 = vst [vmem:[%s4317_s10 + $0xa8] sm:$0xff] %v2350_v27 }
 0x22f   : > { %v2259_v3 = vpop.f32.mrf.mxu0 }
 0x230   : > { %v2260_v45 = vadd.f32 %v4308_v21, %v2259_v3 }
 0x231   : > { %v2279_v17 = vpop.f32.mrf.mxu1 }
 0x232   : > { %v2333_v24 = vmax.f32 %v2260_v45, 0.0  ;;  %v2280_v46 = vadd.f32 %v4308_v21, %v2279_v17 }
 0x234   : > { %2365 = vst [vmem:[%s4317_s10 + $0x20] sm:$0xff] %v2333_v24  ;;  %v2341_v43 = vmax.f32 %v2280_v46, 0.0 }
 0x236   : > { %2373 = vst [vmem:[%s4317_s10 + $0x60] sm:$0xff] %v2341_v43 }
 0x237   : > { %v2261_v2 = vpop.f32.mrf.mxu0 }
 0x238   : > { %v2262_v30 = vadd.f32 %v4308_v21, %v2261_v2 }
 0x239   : > { %v2281_v47 = vpop.f32.mrf.mxu1 }
 0x23a   : > { %v2334_v56 = vmax.f32 %v2262_v30, 0.0  ;;  %v2282_v40 = vadd.f32 %v4308_v21, %v2281_v47 }
 0x23c   : > { %2366 = vst [vmem:[%s4317_s10 + $0x28] sm:$0xff] %v2334_v56  ;;  %v2342_v18 = vmax.f32 %v2282_v40, 0.0 }
 0x23e   : > { %2374 = vst [vmem:[%s4317_s10 + $0x68] sm:$0xff] %v2342_v18 }
 0x24f   : > { %v2304_v14 = vpop.f32.mrf.mxu2 }
 0x250   : > { %v2305_v55 = vadd.f32 %v4308_v21, %v2304_v14 }
 0x252   : > { %v2351_v59 = vmax.f32 %v2305_v55, 0.0 }
 0x254   : > { %2383 = vst [vmem:[%s4317_s10 + $0xb0] sm:$0xff] %v2351_v59 }
 0x256   : > { %v2324_v58 = vpop.f32.mrf.mxu3 }
 0x257   : > { %v2325_v12 = vadd.f32 %v4308_v21, %v2324_v58  ;;  %v2306_v22 = vpop.f32.mrf.mxu2 }
 0x258   : > { %v2307_v1 = vadd.f32 %v4308_v21, %v2306_v22 }
 0x259   : > { %v2359_v7 = vmax.f32 %v2325_v12, 0.0 }
 0x25a   : > { %v2352_v23 = vmax.f32 %v2307_v1, 0.0 }
 0x25b   : > { %2391 = vst [vmem:[%s4317_s10 + $0xf0] sm:$0xff] %v2359_v7 }
 0x25c   : > { %2384 = vst [vmem:[%s4317_s10 + $0xb8] sm:$0xff] %v2352_v23 }
 0x25e   : > { %v2326_v35 = vpop.f32.mrf.mxu3 }
 0x25f   : > { %v2327_v62 = vadd.f32 %v4308_v21, %v2326_v35 }
 0x261   : > { %v2360_v60 = vmax.f32 %v2327_v62, 0.0 }
 0x263   : > { %2392 = vst [vmem:[%s4317_s10 + $0xf8] sm:$0xff] %v2360_v60 }
 0x267   : > { %v2284_v37 = vpop.f32.mrf.mxu1 }
 0x268   : > { %v2285_v57 = vadd.f32 %v4308_v21, %v2284_v37  ;;  %v2264_v42 = vpop.f32.mrf.mxu0 }
 0x269   : > { %v2265_v29 = vadd.f32 %v4308_v21, %v2264_v42 }
 0x26a   : > { %v2343_v33 = vmax.f32 %v2285_v57, 0.0 }
 0x26b   : > { %v2335_v39 = vmax.f32 %v2265_v29, 0.0 }
 0x26c   : > { %2375 = vst [vmem:[%s4317_s10 + $0x70] sm:$0xff] %v2343_v33 }
 0x26d   : > { %2367 = vst [vmem:[%s4317_s10 + $0x30] sm:$0xff] %v2335_v39 }
 0x26f   : > { %v2286_v32 = vpop.f32.mrf.mxu1 }
 0x270   : > { %v2287_v13 = vadd.f32 %v4308_v21, %v2286_v32  ;;  %v2266_v53 = vpop.f32.mrf.mxu0 }
 0x271   : > { %v2267_v36 = vadd.f32 %v4308_v21, %v2266_v53 }
 0x272   : > { %v2344_v31 = vmax.f32 %v2287_v13, 0.0 }
 0x273   : > { %v2336_v19 = vmax.f32 %v2267_v36, 0.0 }
 0x274   : > { %2376 = vst [vmem:[%s4317_s10 + $0x78] sm:$0xff] %v2344_v31 }
 0x275   : > { %2368 = vst [vmem:[%s4317_s10 + $0x38] sm:$0xff] %v2336_v19 }
 0x276   : > { %3047 = shalt.err (!%p3044_p5)
}
 0x277   : > { %s3108_s30 = smov 128  }
 0x278   : > { %2878 = dma.vmem_to_hbm [thread:$0]  (%p3169_p4), %s2410_s23, 4096, %s2412_s26, %s2394_s15, %s3108_s30, %s3108_s30, %s3100_s4  }
 0x279 PF: > { %p2884_p6 = scmp.ge.s32.totalorder %s3098_s17, 2  ;;  %s2426_s9 = sand.u32 1, %s3078_s12  }
 0x27a   : > { %s2427_s10 = scalar_lea.sflag [#allocation3], %s2426_s9 }
 0x27b   : > { %p2881_p7 = pnand %p2884_p6, %p3176_p8 }
 0x27d   : > { %p2882_p9 = pneg %p2881_p7 }
 0x27f   : > { %3073 = dma.done.wait (%p2882_p9), %s2427_s10, 4096  }
 0x280   : > { %3075 = vsyncadd (%p2882_p9), %s2427_s10, 4294963200  ;;  %s16_s17 = sadd.s32 1, %s3098_s17   ;;  %s4461_s12 = smov %s3082_s13 }
 0x281   : > { %p13_p10 = scmp.ge.s32.totalorder %s16_s17, 4   ;;  %s4462_s13 = smov %s3086_s14 }
 0x282   : > { %s4463_s14 = smov %s3182_s25  ;;  %s4464_s15 = smov %s3094_s16 }
 0x283   : > { %s4465_s16 = smov %s4467_s20  ;;  %15 = sbr.rel (!%p13_p10) target bundleno = 4 (0x4), region = 69 }
 0x288   :  { %2433 = vsyncpa [#allocation3], 1 }
 0x289   :  { %2435 = vsyncpa [#allocation3 + $0x1], 1 }

</bundles_post_ra>
